<compile_context>
chip_gen: v5e
topology: v5e:2x2
jax: 0.10.0
libtpu: 0.0.40
codegen_flags: <defaults>
</compile_context>

<pallas_src>
import functools

import jax
import jax.numpy as jnp
from jax.experimental import pallas as pl
from jax.experimental.pallas import tpu as pltpu


def _round_up(x, m):
    return (x + m - 1) // m * m


def _make_dense_block_kernel(C, growth, num_layers, H, W, b_con):
    """Build the fused kernel.  Returns (kernel, out_channels, patch_rows).

    Patch scratch row layout (generation-major, tap-major, channel-minor):
      rows [t*Cp, (t+1)*Cp)                       tap t of the original x
      rows [9*Cp + j*9*Gp + t*Gp, ... + Gp)       tap t of layer-j output
    Layer l's matmul consumes a contiguous 8-aligned row range that is fully
    written earlier in the SAME grid step -> no scratch zero-init needed.
    """
    L = num_layers
    Cp = _round_up(C, 8)
    Gp = _round_up(growth, 8)
    patch_rows = 9 * (Cp + max(L - 1, 0) * Gp)

    # (k_start, k_len) of patch rows consumed by each layer's matmul.
    layer_slices = []
    for l in range(L):
        if b_con:
            layer_slices.append((0, 9 * (Cp + l * Gp)))
        elif l == 0:
            layer_slices.append((0, 9 * Cp))
        else:
            layer_slices.append((9 * Cp + (l - 1) * 9 * Gp, 9 * Gp))

    out_channels = C + L * growth if b_con else growth
    shifts = [(kh - 1) * W + (kw - 1) for kh in range(3) for kw in range(3)]

    def kernel(*refs):
        mask_ref = refs[0]                 # (9, lanes) f32 {0,1}, VMEM-resident
        x_ref = refs[1]                    # (C, lanes)
        o_ref = refs[2 + 3 * L]            # (out_channels, lanes)
        patch_ref = refs[3 + 3 * L]        # (patch_rows, lanes) scratch
        lanes = x_ref.shape[-1]

        def im2col_append(val, base, stride):
            # val: (stride, lanes) slab, alignment-pad rows already zero.
            # tap = lane roll (XLU) + border-mask multiply (VPU); stores are
            # full 8-aligned slabs (no vst.msk partial stores).
            for t, s in enumerate(shifts):
                if s == 0:
                    tapped = val                       # centre tap: no roll/mask
                else:
                    tapped = (pltpu.roll(val, (-s) % lanes, axis=1)
                              * mask_ref[t:t + 1, :])
                patch_ref[base + t * stride:base + (t + 1) * stride, :] = tapped

        # --- once per grid step: copy x into the output, im2col x (only once).
        x_val = x_ref[...]
        if b_con:
            o_ref[L * growth:L * growth + C, :] = x_val
        if Cp > C:
            x_val = jnp.concatenate(
                [x_val, jnp.zeros((Cp - C, lanes), x_val.dtype)], axis=0)
        im2col_append(x_val, 0, Cp)

        # --- dense layers: one wide MXU matmul + folded-BN/ReLU epilogue each.
        for l in range(L):
            w_ref = refs[2 + 3 * l]        # (growth, k_len), VMEM-resident
            scale_ref = refs[3 + 3 * l]    # (growth, 1) folded BN scale
            shift_ref = refs[4 + 3 * l]    # (growth, 1) folded BN shift
            k_start, k_len = layer_slices[l]

            acc = jnp.dot(w_ref[...], patch_ref[k_start:k_start + k_len, :],
                          preferred_element_type=jnp.float32)
            y = jnp.maximum(acc * scale_ref[...] + shift_ref[...], 0.0)
            # Dropout2d: identity in eval mode.

            if b_con:
                o_ref[(L - 1 - l) * growth:(L - l) * growth, :] = (
                    y.astype(o_ref.dtype))
            elif l == L - 1:
                o_ref[...] = y.astype(o_ref.dtype)

            if l < L - 1:
                if Gp > growth:
                    y = jnp.concatenate(
                        [y, jnp.zeros((Gp - growth, lanes), y.dtype)], axis=0)
                # Incremental im2col: only the new channels are rolled/stored.
                im2col_append(y, 9 * Cp + l * 9 * Gp, Gp)

    return kernel, out_channels, patch_rows


def _pack_tap_major(w_sub, cpad):
    """(Cout, Cin, 3, 3) -> (Cout, 9*cpad): tap-major, channel-minor; channel
    columns [Cin, cpad) are zero (they face in-register-zeroed pad rows)."""
    cout, cin = w_sub.shape[0], w_sub.shape[1]
    w = jnp.transpose(w_sub, (0, 2, 3, 1)).reshape(cout, 9, cin)
    if cpad > cin:
        w = jnp.pad(w, ((0, 0), (0, 0), (0, cpad - cin)))
    return w.reshape(cout, 9 * cpad)


def _pack_dense_weight(w_oihw, layer_idx, C, growth, b_con):
    """Reorder a PyTorch OIHW conv weight into the patch-scratch column layout
    [x-block | out_0-block | out_1-block | ...] used by layer `layer_idx`."""
    Cp, Gp = _round_up(C, 8), _round_up(growth, 8)
    if not b_con:
        return _pack_tap_major(w_oihw, Cp if layer_idx == 0 else Gp)
    l = layer_idx
    # PyTorch input channel order at layer l is [out_{l-1}, ..., out_0, x].
    blocks = [_pack_tap_major(w_oihw[:, l * growth:l * growth + C], Cp)]
    for j in range(l):                         # patch order: out_0, out_1, ...
        py = (l - 1 - j) * growth
        blocks.append(_pack_tap_major(w_oihw[:, py:py + growth], Gp))
    return jnp.concatenate(blocks, axis=1)


def _border_masks(H, W, nb):
    """(9, nb*H*W) float {0,1}: validity of each 3x3 tap, tiled per folded
    image so pltpu.roll wraparound across image boundaries is always zeroed."""
    q = jnp.arange(H * W)
    hh, ww = q // W, q % W
    rows = []
    for kh in range(3):
        for kw in range(3):
            dh, dw = kh - 1, kw - 1
            rows.append((hh + dh >= 0) & (hh + dh < H)
                        & (ww + dw >= 0) & (ww + dw < W))
    m = jnp.stack(rows, axis=0).astype(jnp.float32)
    return jnp.tile(m, (1, nb))


def _choose_batch_fold(N, HW, C, out_channels, patch_rows, budget=40 << 20):
    """NB = images folded into the lane axis per grid step: largest NB with
    N % NB == 0, >= 2 grid steps when N >= 2 (both v7x TCs busy), a lane block
    that is a multiple of 128, and a per-step VMEM footprint under budget."""
    def step_bytes(nb):
        lanes = nb * HW
        return 4 * lanes * (patch_rows + 9 + 2 * (C + out_channels))
    best = 1
    for nb in range(1, N + 1):
        if N % nb or (N >= 2 and N // nb < 2) or step_bytes(nb) > budget:
            continue
        if (nb * HW) % 128 and nb != N:
            continue
        best = nb
    if (best * HW) % 128 and best != N:
        best = N            # full-extent lane block is always a legal BlockSpec
    return best, step_bytes(best)


@functools.partial(jax.jit, static_argnames=("b_con",))
def dense_block_forward(x_nchw, params, b_con=True):
    """Fused Pallas DenseBlock forward (eval semantics).  NCHW in / NCHW out."""
    N, C, H, W = x_nchw.shape
    HW = H * W
    L = len(params)
    growth = params[0][0].shape[0]

    kernel, out_channels, patch_rows = _make_dense_block_kernel(
        C, growth, L, H, W, b_con)
    nb, step_bytes = _choose_batch_fold(N, HW, C, out_channels, patch_rows)
    steps = N // nb
    lanes = nb * HW
    # TODO(synk): for large H*W also tile the spatial axis (lane chunks with a
    # one-row halo) so one step fits v7x's 64 MiB VMEM; unnecessary at 16x16.
    vmem_limit = int(min(56 << 20, max(32 << 20, 2 * step_bytes)))

    # Lane-dense layout: channels on sublanes, nb*H*W on lanes (layout plumbing
    # done once in the wrapper, outside the kernel).
    x2d = jnp.transpose(x_nchw.reshape(N, C, HW), (1, 0, 2)).reshape(C, N * HW)
    masks = _border_masks(H, W, nb)

    inputs = [masks, x2d]
    in_specs = [
        pl.BlockSpec((9, lanes), lambda i: (0, 0)),          # VMEM-resident
        pl.BlockSpec((C, lanes), lambda i: (0, i)),
    ]
    for l, (w_oihw, scale, shift) in enumerate(params):
        w_packed = _pack_dense_weight(w_oihw, l, C, growth, b_con)
        inputs += [w_packed, scale.reshape(growth, 1), shift.reshape(growth, 1)]
        in_specs += [
            pl.BlockSpec(w_packed.shape, lambda i: (0, 0)),  # VMEM-resident
            pl.BlockSpec((growth, 1), lambda i: (0, 0)),
            pl.BlockSpec((growth, 1), lambda i: (0, 0)),
        ]

    out2d = pl.pallas_call(
        kernel,
        out_shape=jax.ShapeDtypeStruct((out_channels, N * HW), jnp.float32),
        grid=(steps,),
        in_specs=in_specs,
        out_specs=pl.BlockSpec((out_channels, lanes), lambda i: (0, i)),
        scratch_shapes=[pltpu.VMEM((patch_rows, lanes), jnp.float32)],
        compiler_params=pltpu.CompilerParams(
            dimension_semantics=("parallel",),   # 2 TCs on v7x; loop elsewhere
            vmem_limit_bytes=vmem_limit),
    )(*inputs)

    return (out2d.reshape(out_channels, N, HW)
            .transpose(1, 0, 2).reshape(N, out_channels, H, W))


def init_dense_block_params(key, in_channels, growth_rate, num_layers,
                            b_con=True, eps=1e-5):
    """Synthetic params with PyTorch shapes; conv bias + BatchNorm (eval,
    running stats) pre-folded into per-channel scale/shift."""
    params = []
    for i in range(num_layers):
        cin = (in_channels + i * growth_rate) if b_con else (
            in_channels if i == 0 else growth_rate)
        cout = growth_rate
        key, kw, kb, kg, kbe, km, kv = jax.random.split(key, 7)
        w = jax.random.normal(kw, (cout, cin, 3, 3), jnp.float32) * 0.1
        bias = jax.random.normal(kb, (cout,), jnp.float32) * 0.1
        gamma = 1.0 + 0.1 * jax.random.normal(kg, (cout,), jnp.float32)
        beta = 0.1 * jax.random.normal(kbe, (cout,), jnp.float32)
        mean = 0.1 * jax.random.normal(km, (cout,), jnp.float32)
        var = 1.0 + 0.1 * jax.random.uniform(kv, (cout,), jnp.float32)
        scale = gamma / jnp.sqrt(var + eps)
        shift = beta + scale * (bias - mean)
        params.append((w, scale, shift))
    return params


def _reference_forward(x_nchw, params, b_con=True):
    """Pure-JAX reference (lax.conv, NCHW) for correctness checking."""
    x = x_nchw
    for w, scale, shift in params:
        cout = w.shape[0]
        if b_con:
            temp = x
        y = jax.lax.conv_general_dilated(
            x, w, window_strides=(1, 1), padding="SAME",
            dimension_numbers=("NCHW", "OIHW", "NCHW"),
            precision=jax.lax.Precision.HIGHEST)
        y = jnp.maximum(y * scale.reshape(1, cout, 1, 1)
                        + shift.reshape(1, cout, 1, 1), 0.0)
        x = jnp.concatenate([y, temp], axis=1) if b_con else y
    return x


if __name__ == "__main__":
    # DenseBlock(in_channels=4, growth_rate=8, num_layers=3, b_con=True),
    # input (N, C, H, W) = (2, 4, 16, 16)  ->  output (2, 28, 16, 16).
    N, C, H, W = 2, 4, 16, 16
    growth_rate, num_layers = 8, 3

    key = jax.random.PRNGKey(0)
    k_x, k_p = jax.random.split(key)
    x = jax.random.normal(k_x, (N, C, H, W), jnp.float32)
    params = init_dense_block_params(k_p, C, growth_rate, num_layers,
                                     b_con=True)

    out = jax.block_until_ready(dense_block_forward(x, params, b_con=True))
    assert out.shape == (N, C + num_layers * growth_rate, H, W), out.shape

    ref = _reference_forward(x, params, b_con=True)
    max_err = float(jnp.max(jnp.abs(out - ref)))
    assert jnp.allclose(out, ref, atol=1e-4, rtol=1e-4), max_err

    print("KERNEL_OK")
</pallas_src>

<mosaic_0001>
module attributes {stable_mosaic.version = 11 : i64} {
  func.func @kernel(%arg0: i32, %arg1: memref<9x256xf32, #tpu.memory_space<vmem>>, %arg2: memref<4x256xf32, #tpu.memory_space<vmem>>, %arg3: memref<8x72xf32, #tpu.memory_space<vmem>>, %arg4: memref<8x1xf32, #tpu.memory_space<vmem>>, %arg5: memref<8x1xf32, #tpu.memory_space<vmem>>, %arg6: memref<8x144xf32, #tpu.memory_space<vmem>>, %arg7: memref<8x1xf32, #tpu.memory_space<vmem>>, %arg8: memref<8x1xf32, #tpu.memory_space<vmem>>, %arg9: memref<8x216xf32, #tpu.memory_space<vmem>>, %arg10: memref<8x1xf32, #tpu.memory_space<vmem>>, %arg11: memref<8x1xf32, #tpu.memory_space<vmem>>, %arg12: memref<28x256xf32, #tpu.memory_space<vmem>>, %arg13: memref<216x256xf32, #tpu.memory_space<vmem>>) attributes {dimension_semantics = [#tpu.dimension_semantics<parallel>], iteration_bounds = array<i64: 2>, scalar_prefetch = 0 : i64, scratch_operands = 1 : i64, tpu.core_type = #tpu.core_type<tc>, window_params = [{pipeline_mode = #tpu.pipeline_mode<synchronous>, transform_indices = @transform_0, window_bounds = array<i64: 9, 256>}, {transform_indices = @transform_1, window_bounds = array<i64: 4, 256>}, {pipeline_mode = #tpu.pipeline_mode<synchronous>, transform_indices = @transform_2, window_bounds = array<i64: 8, 72>}, {pipeline_mode = #tpu.pipeline_mode<synchronous>, transform_indices = @transform_3, window_bounds = array<i64: 8, 1>}, {pipeline_mode = #tpu.pipeline_mode<synchronous>, transform_indices = @transform_4, window_bounds = array<i64: 8, 1>}, {pipeline_mode = #tpu.pipeline_mode<synchronous>, transform_indices = @transform_5, window_bounds = array<i64: 8, 144>}, {pipeline_mode = #tpu.pipeline_mode<synchronous>, transform_indices = @transform_6, window_bounds = array<i64: 8, 1>}, {pipeline_mode = #tpu.pipeline_mode<synchronous>, transform_indices = @transform_7, window_bounds = array<i64: 8, 1>}, {pipeline_mode = #tpu.pipeline_mode<synchronous>, transform_indices = @transform_8, window_bounds = array<i64: 8, 216>}, {pipeline_mode = #tpu.pipeline_mode<synchronous>, transform_indices = @transform_9, window_bounds = array<i64: 8, 1>}, {pipeline_mode = #tpu.pipeline_mode<synchronous>, transform_indices = @transform_10, window_bounds = array<i64: 8, 1>}, {transform_indices = @transform_11, window_bounds = array<i64: 28, 256>}]} {
    %c0 = arith.constant 0 : index
    %c0_0 = arith.constant 0 : index
    %0 = vector.load %arg2[%c0, %c0_0] : memref<4x256xf32, #tpu.memory_space<vmem>>, vector<4x256xf32>
    %c24 = arith.constant 24 : index
    %c0_1 = arith.constant 0 : index
    %1 = vector.load %arg12[%c24, %c0_1] : memref<28x256xf32, #tpu.memory_space<vmem>>, vector<4x256xf32>
    tpu.vector_store %arg12[%c24, %c0_1], %0 {strides = array<i32>} : memref<28x256xf32, #tpu.memory_space<vmem>>, vector<4x256xf32>,
    %cst = arith.constant 0.000000e+00 : f32
    %2 = vector.broadcast %cst : f32 to vector<4x256xf32>
    %3 = tpu.concatenate %0, %2 in 0 : vector<4x256xf32>, vector<4x256xf32> -> vector<8x256xf32>
    %c17_i32 = arith.constant 17 : i32
    %4 = tpu.dynamic_rotate %3 by %c17_i32 dim 1 : vector<8x256xf32>, i32 -> vector<8x256xf32>
    %c0_2 = arith.constant 0 : index
    %c0_3 = arith.constant 0 : index
    %5 = vector.load %arg1[%c0_2, %c0_3] : memref<9x256xf32, #tpu.memory_space<vmem>>, vector<1x256xf32>
    %6 = vector.broadcast %5 : vector<1x256xf32> to vector<8x256xf32>
    %7 = arith.mulf %4, %6 : vector<8x256xf32>
    %c0_4 = arith.constant 0 : index
    %c0_5 = arith.constant 0 : index
    %8 = vector.load %arg13[%c0_4, %c0_5] : memref<216x256xf32, #tpu.memory_space<vmem>>, vector<8x256xf32>
    tpu.vector_store %arg13[%c0_4, %c0_5], %7 {strides = array<i32>} : memref<216x256xf32, #tpu.memory_space<vmem>>, vector<8x256xf32>,
    %c16_i32 = arith.constant 16 : i32
    %9 = tpu.dynamic_rotate %3 by %c16_i32 dim 1 : vector<8x256xf32>, i32 -> vector<8x256xf32>
    %c1 = arith.constant 1 : index
    %c0_6 = arith.constant 0 : index
    %10 = vector.load %arg1[%c1, %c0_6] : memref<9x256xf32, #tpu.memory_space<vmem>>, vector<1x256xf32>
    %11 = vector.broadcast %10 : vector<1x256xf32> to vector<8x256xf32>
    %12 = arith.mulf %9, %11 : vector<8x256xf32>
    %c8 = arith.constant 8 : index
    %c0_7 = arith.constant 0 : index
    %13 = vector.load %arg13[%c8, %c0_7] : memref<216x256xf32, #tpu.memory_space<vmem>>, vector<8x256xf32>
    tpu.vector_store %arg13[%c8, %c0_7], %12 {strides = array<i32>} : memref<216x256xf32, #tpu.memory_space<vmem>>, vector<8x256xf32>,
    %c15_i32 = arith.constant 15 : i32
    %14 = tpu.dynamic_rotate %3 by %c15_i32 dim 1 : vector<8x256xf32>, i32 -> vector<8x256xf32>
    %c2 = arith.constant 2 : index
    %c0_8 = arith.constant 0 : index
    %15 = vector.load %arg1[%c2, %c0_8] : memref<9x256xf32, #tpu.memory_space<vmem>>, vector<1x256xf32>
    %16 = vector.broadcast %15 : vector<1x256xf32> to vector<8x256xf32>
    %17 = arith.mulf %14, %16 : vector<8x256xf32>
    %c16 = arith.constant 16 : index
    %c0_9 = arith.constant 0 : index
    %18 = vector.load %arg13[%c16, %c0_9] : memref<216x256xf32, #tpu.memory_space<vmem>>, vector<8x256xf32>
    tpu.vector_store %arg13[%c16, %c0_9], %17 {strides = array<i32>} : memref<216x256xf32, #tpu.memory_space<vmem>>, vector<8x256xf32>,
    %c1_i32 = arith.constant 1 : i32
    %19 = tpu.dynamic_rotate %3 by %c1_i32 dim 1 : vector<8x256xf32>, i32 -> vector<8x256xf32>
    %c3 = arith.constant 3 : index
    %c0_10 = arith.constant 0 : index
    %20 = vector.load %arg1[%c3, %c0_10] : memref<9x256xf32, #tpu.memory_space<vmem>>, vector<1x256xf32>
    %21 = vector.broadcast %20 : vector<1x256xf32> to vector<8x256xf32>
    %22 = arith.mulf %19, %21 : vector<8x256xf32>
    %c24_11 = arith.constant 24 : index
    %c0_12 = arith.constant 0 : index
    %23 = vector.load %arg13[%c24_11, %c0_12] : memref<216x256xf32, #tpu.memory_space<vmem>>, vector<8x256xf32>
    tpu.vector_store %arg13[%c24_11, %c0_12], %22 {strides = array<i32>} : memref<216x256xf32, #tpu.memory_space<vmem>>, vector<8x256xf32>,
    %c32 = arith.constant 32 : index
    %c0_13 = arith.constant 0 : index
    %24 = vector.load %arg13[%c32, %c0_13] : memref<216x256xf32, #tpu.memory_space<vmem>>, vector<8x256xf32>
    tpu.vector_store %arg13[%c32, %c0_13], %3 {strides = array<i32>} : memref<216x256xf32, #tpu.memory_space<vmem>>, vector<8x256xf32>,
    %c255_i32 = arith.constant 255 : i32
    %25 = tpu.dynamic_rotate %3 by %c255_i32 dim 1 : vector<8x256xf32>, i32 -> vector<8x256xf32>
    %c5 = arith.constant 5 : index
    %c0_14 = arith.constant 0 : index
    %26 = vector.load %arg1[%c5, %c0_14] : memref<9x256xf32, #tpu.memory_space<vmem>>, vector<1x256xf32>
    %27 = vector.broadcast %26 : vector<1x256xf32> to vector<8x256xf32>
    %28 = arith.mulf %25, %27 : vector<8x256xf32>
    %c40 = arith.constant 40 : index
    %c0_15 = arith.constant 0 : index
    %29 = vector.load %arg13[%c40, %c0_15] : memref<216x256xf32, #tpu.memory_space<vmem>>, vector<8x256xf32>
    tpu.vector_store %arg13[%c40, %c0_15], %28 {strides = array<i32>} : memref<216x256xf32, #tpu.memory_space<vmem>>, vector<8x256xf32>,
    %c241_i32 = arith.constant 241 : i32
    %30 = tpu.dynamic_rotate %3 by %c241_i32 dim 1 : vector<8x256xf32>, i32 -> vector<8x256xf32>
    %c6 = arith.constant 6 : index
    %c0_16 = arith.constant 0 : index
    %31 = vector.load %arg1[%c6, %c0_16] : memref<9x256xf32, #tpu.memory_space<vmem>>, vector<1x256xf32>
    %32 = vector.broadcast %31 : vector<1x256xf32> to vector<8x256xf32>
    %33 = arith.mulf %30, %32 : vector<8x256xf32>
    %c48 = arith.constant 48 : index
    %c0_17 = arith.constant 0 : index
    %34 = vector.load %arg13[%c48, %c0_17] : memref<216x256xf32, #tpu.memory_space<vmem>>, vector<8x256xf32>
    tpu.vector_store %arg13[%c48, %c0_17], %33 {strides = array<i32>} : memref<216x256xf32, #tpu.memory_space<vmem>>, vector<8x256xf32>,
    %c240_i32 = arith.constant 240 : i32
    %35 = tpu.dynamic_rotate %3 by %c240_i32 dim 1 : vector<8x256xf32>, i32 -> vector<8x256xf32>
    %c7 = arith.constant 7 : index
    %c0_18 = arith.constant 0 : index
    %36 = vector.load %arg1[%c7, %c0_18] : memref<9x256xf32, #tpu.memory_space<vmem>>, vector<1x256xf32>
    %37 = vector.broadcast %36 : vector<1x256xf32> to vector<8x256xf32>
    %38 = arith.mulf %35, %37 : vector<8x256xf32>
    %c56 = arith.constant 56 : index
    %c0_19 = arith.constant 0 : index
    %39 = vector.load %arg13[%c56, %c0_19] : memref<216x256xf32, #tpu.memory_space<vmem>>, vector<8x256xf32>
    tpu.vector_store %arg13[%c56, %c0_19], %38 {strides = array<i32>} : memref<216x256xf32, #tpu.memory_space<vmem>>, vector<8x256xf32>,
    %c239_i32 = arith.constant 239 : i32
    %40 = tpu.dynamic_rotate %3 by %c239_i32 dim 1 : vector<8x256xf32>, i32 -> vector<8x256xf32>
    %c8_20 = arith.constant 8 : index
    %c0_21 = arith.constant 0 : index
    %41 = vector.load %arg1[%c8_20, %c0_21] : memref<9x256xf32, #tpu.memory_space<vmem>>, vector<1x256xf32>
    %42 = vector.broadcast %41 : vector<1x256xf32> to vector<8x256xf32>
    %43 = arith.mulf %40, %42 : vector<8x256xf32>
    %c64 = arith.constant 64 : index
    %c0_22 = arith.constant 0 : index
    %44 = vector.load %arg13[%c64, %c0_22] : memref<216x256xf32, #tpu.memory_space<vmem>>, vector<8x256xf32>
    tpu.vector_store %arg13[%c64, %c0_22], %43 {strides = array<i32>} : memref<216x256xf32, #tpu.memory_space<vmem>>, vector<8x256xf32>,
    %c0_23 = arith.constant 0 : index
    %c0_24 = arith.constant 0 : index
    %45 = vector.load %arg3[%c0_23, %c0_24] : memref<8x72xf32, #tpu.memory_space<vmem>>, vector<8x72xf32>
    %c0_25 = arith.constant 0 : index
    %c0_26 = arith.constant 0 : index
    %46 = vector.load %arg13[%c0_25, %c0_26] : memref<216x256xf32, #tpu.memory_space<vmem>>, vector<72x256xf32>
    %cst_27 = arith.constant dense<0.000000e+00> : vector<8x256xf32>
    %47 = tpu.matmul %45, %46, %cst_27 {dimension_numbers = #tpu.dot_dimension_numbers<[1], [0], [0], [1], [0, 0, 1, 1], [], []>} : vector<8x72xf32>, vector<72x256xf32>, vector<8x256xf32> -> vector<8x256xf32>
    %c0_28 = arith.constant 0 : index
    %c0_29 = arith.constant 0 : index
    %48 = vector.load %arg4[%c0_28, %c0_29] : memref<8x1xf32, #tpu.memory_space<vmem>>, vector<8x1xf32>
    %49 = vector.broadcast %48 : vector<8x1xf32> to vector<8x256xf32>
    %50 = arith.mulf %47, %49 : vector<8x256xf32>
    %c0_30 = arith.constant 0 : index
    %c0_31 = arith.constant 0 : index
    %51 = vector.load %arg5[%c0_30, %c0_31] : memref<8x1xf32, #tpu.memory_space<vmem>>, vector<8x1xf32>
    %52 = vector.broadcast %51 : vector<8x1xf32> to vector<8x256xf32>
    %53 = arith.addf %50, %52 : vector<8x256xf32>
    %cst_32 = arith.constant 0.000000e+00 : f32
    %54 = vector.broadcast %cst_32 : f32 to vector<8x256xf32>
    %55 = arith.maximumf %53, %54 : vector<8x256xf32>
    %c16_33 = arith.constant 16 : index
    %c0_34 = arith.constant 0 : index
    %56 = vector.load %arg12[%c16_33, %c0_34] : memref<28x256xf32, #tpu.memory_space<vmem>>, vector<8x256xf32>
    tpu.vector_store %arg12[%c16_33, %c0_34], %55 {strides = array<i32>} : memref<28x256xf32, #tpu.memory_space<vmem>>, vector<8x256xf32>,
    %c17_i32_35 = arith.constant 17 : i32
    %57 = tpu.dynamic_rotate %55 by %c17_i32_35 dim 1 : vector<8x256xf32>, i32 -> vector<8x256xf32>
    %c0_36 = arith.constant 0 : index
    %c0_37 = arith.constant 0 : index
    %58 = vector.load %arg1[%c0_36, %c0_37] : memref<9x256xf32, #tpu.memory_space<vmem>>, vector<1x256xf32>
    %59 = vector.broadcast %58 : vector<1x256xf32> to vector<8x256xf32>
    %60 = arith.mulf %57, %59 : vector<8x256xf32>
    %c72 = arith.constant 72 : index
    %c0_38 = arith.constant 0 : index
    %61 = vector.load %arg13[%c72, %c0_38] : memref<216x256xf32, #tpu.memory_space<vmem>>, vector<8x256xf32>
    tpu.vector_store %arg13[%c72, %c0_38], %60 {strides = array<i32>} : memref<216x256xf32, #tpu.memory_space<vmem>>, vector<8x256xf32>,
    %c16_i32_39 = arith.constant 16 : i32
    %62 = tpu.dynamic_rotate %55 by %c16_i32_39 dim 1 : vector<8x256xf32>, i32 -> vector<8x256xf32>
    %c1_40 = arith.constant 1 : index
    %c0_41 = arith.constant 0 : index
    %63 = vector.load %arg1[%c1_40, %c0_41] : memref<9x256xf32, #tpu.memory_space<vmem>>, vector<1x256xf32>
    %64 = vector.broadcast %63 : vector<1x256xf32> to vector<8x256xf32>
    %65 = arith.mulf %62, %64 : vector<8x256xf32>
    %c80 = arith.constant 80 : index
    %c0_42 = arith.constant 0 : index
    %66 = vector.load %arg13[%c80, %c0_42] : memref<216x256xf32, #tpu.memory_space<vmem>>, vector<8x256xf32>
    tpu.vector_store %arg13[%c80, %c0_42], %65 {strides = array<i32>} : memref<216x256xf32, #tpu.memory_space<vmem>>, vector<8x256xf32>,
    %c15_i32_43 = arith.constant 15 : i32
    %67 = tpu.dynamic_rotate %55 by %c15_i32_43 dim 1 : vector<8x256xf32>, i32 -> vector<8x256xf32>
    %c2_44 = arith.constant 2 : index
    %c0_45 = arith.constant 0 : index
    %68 = vector.load %arg1[%c2_44, %c0_45] : memref<9x256xf32, #tpu.memory_space<vmem>>, vector<1x256xf32>
    %69 = vector.broadcast %68 : vector<1x256xf32> to vector<8x256xf32>
    %70 = arith.mulf %67, %69 : vector<8x256xf32>
    %c88 = arith.constant 88 : index
    %c0_46 = arith.constant 0 : index
    %71 = vector.load %arg13[%c88, %c0_46] : memref<216x256xf32, #tpu.memory_space<vmem>>, vector<8x256xf32>
    tpu.vector_store %arg13[%c88, %c0_46], %70 {strides = array<i32>} : memref<216x256xf32, #tpu.memory_space<vmem>>, vector<8x256xf32>,
    %c1_i32_47 = arith.constant 1 : i32
    %72 = tpu.dynamic_rotate %55 by %c1_i32_47 dim 1 : vector<8x256xf32>, i32 -> vector<8x256xf32>
    %c3_48 = arith.constant 3 : index
    %c0_49 = arith.constant 0 : index
    %73 = vector.load %arg1[%c3_48, %c0_49] : memref<9x256xf32, #tpu.memory_space<vmem>>, vector<1x256xf32>
    %74 = vector.broadcast %73 : vector<1x256xf32> to vector<8x256xf32>
    %75 = arith.mulf %72, %74 : vector<8x256xf32>
    %c96 = arith.constant 96 : index
    %c0_50 = arith.constant 0 : index
    %76 = vector.load %arg13[%c96, %c0_50] : memref<216x256xf32, #tpu.memory_space<vmem>>, vector<8x256xf32>
    tpu.vector_store %arg13[%c96, %c0_50], %75 {strides = array<i32>} : memref<216x256xf32, #tpu.memory_space<vmem>>, vector<8x256xf32>,
    %c104 = arith.constant 104 : index
    %c0_51 = arith.constant 0 : index
    %77 = vector.load %arg13[%c104, %c0_51] : memref<216x256xf32, #tpu.memory_space<vmem>>, vector<8x256xf32>
    tpu.vector_store %arg13[%c104, %c0_51], %55 {strides = array<i32>} : memref<216x256xf32, #tpu.memory_space<vmem>>, vector<8x256xf32>,
    %c255_i32_52 = arith.constant 255 : i32
    %78 = tpu.dynamic_rotate %55 by %c255_i32_52 dim 1 : vector<8x256xf32>, i32 -> vector<8x256xf32>
    %c5_53 = arith.constant 5 : index
    %c0_54 = arith.constant 0 : index
    %79 = vector.load %arg1[%c5_53, %c0_54] : memref<9x256xf32, #tpu.memory_space<vmem>>, vector<1x256xf32>
    %80 = vector.broadcast %79 : vector<1x256xf32> to vector<8x256xf32>
    %81 = arith.mulf %78, %80 : vector<8x256xf32>
    %c112 = arith.constant 112 : index
    %c0_55 = arith.constant 0 : index
    %82 = vector.load %arg13[%c112, %c0_55] : memref<216x256xf32, #tpu.memory_space<vmem>>, vector<8x256xf32>
    tpu.vector_store %arg13[%c112, %c0_55], %81 {strides = array<i32>} : memref<216x256xf32, #tpu.memory_space<vmem>>, vector<8x256xf32>,
    %c241_i32_56 = arith.constant 241 : i32
    %83 = tpu.dynamic_rotate %55 by %c241_i32_56 dim 1 : vector<8x256xf32>, i32 -> vector<8x256xf32>
    %c6_57 = arith.constant 6 : index
    %c0_58 = arith.constant 0 : index
    %84 = vector.load %arg1[%c6_57, %c0_58] : memref<9x256xf32, #tpu.memory_space<vmem>>, vector<1x256xf32>
    %85 = vector.broadcast %84 : vector<1x256xf32> to vector<8x256xf32>
    %86 = arith.mulf %83, %85 : vector<8x256xf32>
    %c120 = arith.constant 120 : index
    %c0_59 = arith.constant 0 : index
    %87 = vector.load %arg13[%c120, %c0_59] : memref<216x256xf32, #tpu.memory_space<vmem>>, vector<8x256xf32>
    tpu.vector_store %arg13[%c120, %c0_59], %86 {strides = array<i32>} : memref<216x256xf32, #tpu.memory_space<vmem>>, vector<8x256xf32>,
    %c240_i32_60 = arith.constant 240 : i32
    %88 = tpu.dynamic_rotate %55 by %c240_i32_60 dim 1 : vector<8x256xf32>, i32 -> vector<8x256xf32>
    %c7_61 = arith.constant 7 : index
    %c0_62 = arith.constant 0 : index
    %89 = vector.load %arg1[%c7_61, %c0_62] : memref<9x256xf32, #tpu.memory_space<vmem>>, vector<1x256xf32>
    %90 = vector.broadcast %89 : vector<1x256xf32> to vector<8x256xf32>
    %91 = arith.mulf %88, %90 : vector<8x256xf32>
    %c128 = arith.constant 128 : index
    %c0_63 = arith.constant 0 : index
    %92 = vector.load %arg13[%c128, %c0_63] : memref<216x256xf32, #tpu.memory_space<vmem>>, vector<8x256xf32>
    tpu.vector_store %arg13[%c128, %c0_63], %91 {strides = array<i32>} : memref<216x256xf32, #tpu.memory_space<vmem>>, vector<8x256xf32>,
    %c239_i32_64 = arith.constant 239 : i32
    %93 = tpu.dynamic_rotate %55 by %c239_i32_64 dim 1 : vector<8x256xf32>, i32 -> vector<8x256xf32>
    %c8_65 = arith.constant 8 : index
    %c0_66 = arith.constant 0 : index
    %94 = vector.load %arg1[%c8_65, %c0_66] : memref<9x256xf32, #tpu.memory_space<vmem>>, vector<1x256xf32>
    %95 = vector.broadcast %94 : vector<1x256xf32> to vector<8x256xf32>
    %96 = arith.mulf %93, %95 : vector<8x256xf32>
    %c136 = arith.constant 136 : index
    %c0_67 = arith.constant 0 : index
    %97 = vector.load %arg13[%c136, %c0_67] : memref<216x256xf32, #tpu.memory_space<vmem>>, vector<8x256xf32>
    tpu.vector_store %arg13[%c136, %c0_67], %96 {strides = array<i32>} : memref<216x256xf32, #tpu.memory_space<vmem>>, vector<8x256xf32>,
    %c0_68 = arith.constant 0 : index
    %c0_69 = arith.constant 0 : index
    %98 = vector.load %arg6[%c0_68, %c0_69] : memref<8x144xf32, #tpu.memory_space<vmem>>, vector<8x144xf32>
    %c0_70 = arith.constant 0 : index
    %c0_71 = arith.constant 0 : index
    %99 = vector.load %arg13[%c0_70, %c0_71] : memref<216x256xf32, #tpu.memory_space<vmem>>, vector<144x256xf32>
    %cst_72 = arith.constant dense<0.000000e+00> : vector<8x256xf32>
    %100 = tpu.matmul %98, %99, %cst_72 {dimension_numbers = #tpu.dot_dimension_numbers<[1], [0], [0], [1], [0, 0, 1, 1], [], []>} : vector<8x144xf32>, vector<144x256xf32>, vector<8x256xf32> -> vector<8x256xf32>
    %c0_73 = arith.constant 0 : index
    %c0_74 = arith.constant 0 : index
    %101 = vector.load %arg7[%c0_73, %c0_74] : memref<8x1xf32, #tpu.memory_space<vmem>>, vector<8x1xf32>
    %102 = vector.broadcast %101 : vector<8x1xf32> to vector<8x256xf32>
    %103 = arith.mulf %100, %102 : vector<8x256xf32>
    %c0_75 = arith.constant 0 : index
    %c0_76 = arith.constant 0 : index
    %104 = vector.load %arg8[%c0_75, %c0_76] : memref<8x1xf32, #tpu.memory_space<vmem>>, vector<8x1xf32>
    %105 = vector.broadcast %104 : vector<8x1xf32> to vector<8x256xf32>
    %106 = arith.addf %103, %105 : vector<8x256xf32>
    %cst_77 = arith.constant 0.000000e+00 : f32
    %107 = vector.broadcast %cst_77 : f32 to vector<8x256xf32>
    %108 = arith.maximumf %106, %107 : vector<8x256xf32>
    %c8_78 = arith.constant 8 : index
    %c0_79 = arith.constant 0 : index
    %109 = vector.load %arg12[%c8_78, %c0_79] : memref<28x256xf32, #tpu.memory_space<vmem>>, vector<8x256xf32>
    tpu.vector_store %arg12[%c8_78, %c0_79], %108 {strides = array<i32>} : memref<28x256xf32, #tpu.memory_space<vmem>>, vector<8x256xf32>,
    %c17_i32_80 = arith.constant 17 : i32
    %110 = tpu.dynamic_rotate %108 by %c17_i32_80 dim 1 : vector<8x256xf32>, i32 -> vector<8x256xf32>
    %c0_81 = arith.constant 0 : index
    %c0_82 = arith.constant 0 : index
    %111 = vector.load %arg1[%c0_81, %c0_82] : memref<9x256xf32, #tpu.memory_space<vmem>>, vector<1x256xf32>
    %112 = vector.broadcast %111 : vector<1x256xf32> to vector<8x256xf32>
    %113 = arith.mulf %110, %112 : vector<8x256xf32>
    %c144 = arith.constant 144 : index
    %c0_83 = arith.constant 0 : index
    %114 = vector.load %arg13[%c144, %c0_83] : memref<216x256xf32, #tpu.memory_space<vmem>>, vector<8x256xf32>
    tpu.vector_store %arg13[%c144, %c0_83], %113 {strides = array<i32>} : memref<216x256xf32, #tpu.memory_space<vmem>>, vector<8x256xf32>,
    %c16_i32_84 = arith.constant 16 : i32
    %115 = tpu.dynamic_rotate %108 by %c16_i32_84 dim 1 : vector<8x256xf32>, i32 -> vector<8x256xf32>
    %c1_85 = arith.constant 1 : index
    %c0_86 = arith.constant 0 : index
    %116 = vector.load %arg1[%c1_85, %c0_86] : memref<9x256xf32, #tpu.memory_space<vmem>>, vector<1x256xf32>
    %117 = vector.broadcast %116 : vector<1x256xf32> to vector<8x256xf32>
    %118 = arith.mulf %115, %117 : vector<8x256xf32>
    %c152 = arith.constant 152 : index
    %c0_87 = arith.constant 0 : index
    %119 = vector.load %arg13[%c152, %c0_87] : memref<216x256xf32, #tpu.memory_space<vmem>>, vector<8x256xf32>
    tpu.vector_store %arg13[%c152, %c0_87], %118 {strides = array<i32>} : memref<216x256xf32, #tpu.memory_space<vmem>>, vector<8x256xf32>,
    %c15_i32_88 = arith.constant 15 : i32
    %120 = tpu.dynamic_rotate %108 by %c15_i32_88 dim 1 : vector<8x256xf32>, i32 -> vector<8x256xf32>
    %c2_89 = arith.constant 2 : index
    %c0_90 = arith.constant 0 : index
    %121 = vector.load %arg1[%c2_89, %c0_90] : memref<9x256xf32, #tpu.memory_space<vmem>>, vector<1x256xf32>
    %122 = vector.broadcast %121 : vector<1x256xf32> to vector<8x256xf32>
    %123 = arith.mulf %120, %122 : vector<8x256xf32>
    %c160 = arith.constant 160 : index
    %c0_91 = arith.constant 0 : index
    %124 = vector.load %arg13[%c160, %c0_91] : memref<216x256xf32, #tpu.memory_space<vmem>>, vector<8x256xf32>
    tpu.vector_store %arg13[%c160, %c0_91], %123 {strides = array<i32>} : memref<216x256xf32, #tpu.memory_space<vmem>>, vector<8x256xf32>,
    %c1_i32_92 = arith.constant 1 : i32
    %125 = tpu.dynamic_rotate %108 by %c1_i32_92 dim 1 : vector<8x256xf32>, i32 -> vector<8x256xf32>
    %c3_93 = arith.constant 3 : index
    %c0_94 = arith.constant 0 : index
    %126 = vector.load %arg1[%c3_93, %c0_94] : memref<9x256xf32, #tpu.memory_space<vmem>>, vector<1x256xf32>
    %127 = vector.broadcast %126 : vector<1x256xf32> to vector<8x256xf32>
    %128 = arith.mulf %125, %127 : vector<8x256xf32>
    %c168 = arith.constant 168 : index
    %c0_95 = arith.constant 0 : index
    %129 = vector.load %arg13[%c168, %c0_95] : memref<216x256xf32, #tpu.memory_space<vmem>>, vector<8x256xf32>
    tpu.vector_store %arg13[%c168, %c0_95], %128 {strides = array<i32>} : memref<216x256xf32, #tpu.memory_space<vmem>>, vector<8x256xf32>,
    %c176 = arith.constant 176 : index
    %c0_96 = arith.constant 0 : index
    %130 = vector.load %arg13[%c176, %c0_96] : memref<216x256xf32, #tpu.memory_space<vmem>>, vector<8x256xf32>
    tpu.vector_store %arg13[%c176, %c0_96], %108 {strides = array<i32>} : memref<216x256xf32, #tpu.memory_space<vmem>>, vector<8x256xf32>,
    %c255_i32_97 = arith.constant 255 : i32
    %131 = tpu.dynamic_rotate %108 by %c255_i32_97 dim 1 : vector<8x256xf32>, i32 -> vector<8x256xf32>
    %c5_98 = arith.constant 5 : index
    %c0_99 = arith.constant 0 : index
    %132 = vector.load %arg1[%c5_98, %c0_99] : memref<9x256xf32, #tpu.memory_space<vmem>>, vector<1x256xf32>
    %133 = vector.broadcast %132 : vector<1x256xf32> to vector<8x256xf32>
    %134 = arith.mulf %131, %133 : vector<8x256xf32>
    %c184 = arith.constant 184 : index
    %c0_100 = arith.constant 0 : index
    %135 = vector.load %arg13[%c184, %c0_100] : memref<216x256xf32, #tpu.memory_space<vmem>>, vector<8x256xf32>
    tpu.vector_store %arg13[%c184, %c0_100], %134 {strides = array<i32>} : memref<216x256xf32, #tpu.memory_space<vmem>>, vector<8x256xf32>,
    %c241_i32_101 = arith.constant 241 : i32
    %136 = tpu.dynamic_rotate %108 by %c241_i32_101 dim 1 : vector<8x256xf32>, i32 -> vector<8x256xf32>
    %c6_102 = arith.constant 6 : index
    %c0_103 = arith.constant 0 : index
    %137 = vector.load %arg1[%c6_102, %c0_103] : memref<9x256xf32, #tpu.memory_space<vmem>>, vector<1x256xf32>
    %138 = vector.broadcast %137 : vector<1x256xf32> to vector<8x256xf32>
    %139 = arith.mulf %136, %138 : vector<8x256xf32>
    %c192 = arith.constant 192 : index
    %c0_104 = arith.constant 0 : index
    %140 = vector.load %arg13[%c192, %c0_104] : memref<216x256xf32, #tpu.memory_space<vmem>>, vector<8x256xf32>
    tpu.vector_store %arg13[%c192, %c0_104], %139 {strides = array<i32>} : memref<216x256xf32, #tpu.memory_space<vmem>>, vector<8x256xf32>,
    %c240_i32_105 = arith.constant 240 : i32
    %141 = tpu.dynamic_rotate %108 by %c240_i32_105 dim 1 : vector<8x256xf32>, i32 -> vector<8x256xf32>
    %c7_106 = arith.constant 7 : index
    %c0_107 = arith.constant 0 : index
    %142 = vector.load %arg1[%c7_106, %c0_107] : memref<9x256xf32, #tpu.memory_space<vmem>>, vector<1x256xf32>
    %143 = vector.broadcast %142 : vector<1x256xf32> to vector<8x256xf32>
    %144 = arith.mulf %141, %143 : vector<8x256xf32>
    %c200 = arith.constant 200 : index
    %c0_108 = arith.constant 0 : index
    %145 = vector.load %arg13[%c200, %c0_108] : memref<216x256xf32, #tpu.memory_space<vmem>>, vector<8x256xf32>
    tpu.vector_store %arg13[%c200, %c0_108], %144 {strides = array<i32>} : memref<216x256xf32, #tpu.memory_space<vmem>>, vector<8x256xf32>,
    %c239_i32_109 = arith.constant 239 : i32
    %146 = tpu.dynamic_rotate %108 by %c239_i32_109 dim 1 : vector<8x256xf32>, i32 -> vector<8x256xf32>
    %c8_110 = arith.constant 8 : index
    %c0_111 = arith.constant 0 : index
    %147 = vector.load %arg1[%c8_110, %c0_111] : memref<9x256xf32, #tpu.memory_space<vmem>>, vector<1x256xf32>
    %148 = vector.broadcast %147 : vector<1x256xf32> to vector<8x256xf32>
    %149 = arith.mulf %146, %148 : vector<8x256xf32>
    %c208 = arith.constant 208 : index
    %c0_112 = arith.constant 0 : index
    %150 = vector.load %arg13[%c208, %c0_112] : memref<216x256xf32, #tpu.memory_space<vmem>>, vector<8x256xf32>
    tpu.vector_store %arg13[%c208, %c0_112], %149 {strides = array<i32>} : memref<216x256xf32, #tpu.memory_space<vmem>>, vector<8x256xf32>,
    %c0_113 = arith.constant 0 : index
    %c0_114 = arith.constant 0 : index
    %151 = vector.load %arg9[%c0_113, %c0_114] : memref<8x216xf32, #tpu.memory_space<vmem>>, vector<8x216xf32>
    %c0_115 = arith.constant 0 : index
    %c0_116 = arith.constant 0 : index
    %152 = vector.load %arg13[%c0_115, %c0_116] : memref<216x256xf32, #tpu.memory_space<vmem>>, vector<216x256xf32>
    %cst_117 = arith.constant dense<0.000000e+00> : vector<8x256xf32>
    %153 = tpu.matmul %151, %152, %cst_117 {dimension_numbers = #tpu.dot_dimension_numbers<[1], [0], [0], [1], [0, 0, 1, 1], [], []>} : vector<8x216xf32>, vector<216x256xf32>, vector<8x256xf32> -> vector<8x256xf32>
    %c0_118 = arith.constant 0 : index
    %c0_119 = arith.constant 0 : index
    %154 = vector.load %arg10[%c0_118, %c0_119] : memref<8x1xf32, #tpu.memory_space<vmem>>, vector<8x1xf32>
    %155 = vector.broadcast %154 : vector<8x1xf32> to vector<8x256xf32>
    %156 = arith.mulf %153, %155 : vector<8x256xf32>
    %c0_120 = arith.constant 0 : index
    %c0_121 = arith.constant 0 : index
    %157 = vector.load %arg11[%c0_120, %c0_121] : memref<8x1xf32, #tpu.memory_space<vmem>>, vector<8x1xf32>
    %158 = vector.broadcast %157 : vector<8x1xf32> to vector<8x256xf32>
    %159 = arith.addf %156, %158 : vector<8x256xf32>
    %cst_122 = arith.constant 0.000000e+00 : f32
    %160 = vector.broadcast %cst_122 : f32 to vector<8x256xf32>
    %161 = arith.maximumf %159, %160 : vector<8x256xf32>
    %c0_123 = arith.constant 0 : index
    %c0_124 = arith.constant 0 : index
    %162 = vector.load %arg12[%c0_123, %c0_124] : memref<28x256xf32, #tpu.memory_space<vmem>>, vector<8x256xf32>
    tpu.vector_store %arg12[%c0_123, %c0_124], %161 {strides = array<i32>} : memref<28x256xf32, #tpu.memory_space<vmem>>, vector<8x256xf32>,
    return
  }
  func.func @transform_0(%arg0: i32) -> (i32, i32) {
    %c0_i32 = arith.constant 0 : i32
    %c0_i32_0 = arith.constant 0 : i32
    %c0_i32_1 = arith.constant 0 : i32
    return %c0_i32, %c0_i32_0 : i32, i32
  }
  func.func @transform_1(%arg0: i32) -> (i32, i32) {
    %c0_i32 = arith.constant 0 : i32
    %c0_i32_0 = arith.constant 0 : i32
    return %c0_i32, %arg0 : i32, i32
  }
  func.func @transform_2(%arg0: i32) -> (i32, i32) {
    %c0_i32 = arith.constant 0 : i32
    %c0_i32_0 = arith.constant 0 : i32
    %c0_i32_1 = arith.constant 0 : i32
    return %c0_i32, %c0_i32_0 : i32, i32
  }
  func.func @transform_3(%arg0: i32) -> (i32, i32) {
    %c0_i32 = arith.constant 0 : i32
    %c0_i32_0 = arith.constant 0 : i32
    %c0_i32_1 = arith.constant 0 : i32
    return %c0_i32, %c0_i32_0 : i32, i32
  }
  func.func @transform_4(%arg0: i32) -> (i32, i32) {
    %c0_i32 = arith.constant 0 : i32
    %c0_i32_0 = arith.constant 0 : i32
    %c0_i32_1 = arith.constant 0 : i32
    return %c0_i32, %c0_i32_0 : i32, i32
  }
  func.func @transform_5(%arg0: i32) -> (i32, i32) {
    %c0_i32 = arith.constant 0 : i32
    %c0_i32_0 = arith.constant 0 : i32
    %c0_i32_1 = arith.constant 0 : i32
    return %c0_i32, %c0_i32_0 : i32, i32
  }
  func.func @transform_6(%arg0: i32) -> (i32, i32) {
    %c0_i32 = arith.constant 0 : i32
    %c0_i32_0 = arith.constant 0 : i32
    %c0_i32_1 = arith.constant 0 : i32
    return %c0_i32, %c0_i32_0 : i32, i32
  }
  func.func @transform_7(%arg0: i32) -> (i32, i32) {
    %c0_i32 = arith.constant 0 : i32
    %c0_i32_0 = arith.constant 0 : i32
    %c0_i32_1 = arith.constant 0 : i32
    return %c0_i32, %c0_i32_0 : i32, i32
  }
  func.func @transform_8(%arg0: i32) -> (i32, i32) {
    %c0_i32 = arith.constant 0 : i32
    %c0_i32_0 = arith.constant 0 : i32
    %c0_i32_1 = arith.constant 0 : i32
    return %c0_i32, %c0_i32_0 : i32, i32
  }
  func.func @transform_9(%arg0: i32) -> (i32, i32) {
    %c0_i32 = arith.constant 0 : i32
    %c0_i32_0 = arith.constant 0 : i32
    %c0_i32_1 = arith.constant 0 : i32
    return %c0_i32, %c0_i32_0 : i32, i32
  }
  func.func @transform_10(%arg0: i32) -> (i32, i32) {
    %c0_i32 = arith.constant 0 : i32
    %c0_i32_0 = arith.constant 0 : i32
    %c0_i32_1 = arith.constant 0 : i32
    return %c0_i32, %c0_i32_0 : i32, i32
  }
  func.func @transform_11(%arg0: i32) -> (i32, i32) {
    %c0_i32 = arith.constant 0 : i32
    %c0_i32_0 = arith.constant 0 : i32
    return %c0_i32, %arg0 : i32, i32
  }
}

</mosaic_0001>

<bundles_post_ra>
// kernel: dense_block_forward.1
= control target key start
LH: loop header
LB: loop body
LE: loop exit
PB: predicated region body
PF: predicated region fallthrough
CT: control target
= control target key end

     0   :  { %s1460_s17 = smov 0   ;;  %s1462_s18 = smov 0   ;;  %s2020_s0 = inlined_call_operand.vmem [shape: f32[9,256], index: 0, kind: input, shape index: {}]   ;;  %s2021_s1 = inlined_call_operand.vmem [shape: f32[4,512], index: 1, kind: input, shape index: {}]   ;;  %s2022_s2 = inlined_call_operand.vmem [shape: f32[8,72], index: 2, kind: input, shape index: {}]   ;;  %s2023_s3 = inlined_call_operand.vmem [shape: f32[8,1], index: 3, kind: input, shape index: {}]   ;;  %s2024_s4 = inlined_call_operand.vmem [shape: f32[8,1], index: 4, kind: input, shape index: {}]   ;;  %s2025_s5 = inlined_call_operand.vmem [shape: f32[8,144], index: 5, kind: input, shape index: {}]   ;;  %s2026_s6 = inlined_call_operand.vmem [shape: f32[8,1], index: 6, kind: input, shape index: {}]   ;;  %s2027_s7 = inlined_call_operand.vmem [shape: f32[8,1], index: 7, kind: input, shape index: {}]   ;;  %s2028_s8 = inlined_call_operand.vmem [shape: f32[8,216], index: 8, kind: input, shape index: {}]   ;;  %s2029_s9 = inlined_call_operand.vmem [shape: f32[8,1], index: 9, kind: input, shape index: {}]   ;;  %s2030_s10 = inlined_call_operand.vmem [shape: f32[8,1], index: 10, kind: input, shape index: {}]   ;;  %s2031_s11 = inlined_call_operand.vmem [shape: f32[28,512], index: 11, kind: output, shape index: {}]  }
   0x1   :  { %s1464_s19 = smov 0  }
   0x2 LB: > { %s1473_s20 = sadd.s32 4294967295, %s1389_s19   ;;  %s1475_s21 = sadd.s32 1, %s1389_s19   ;;  %s1389_s19 = sphi %s1464_s19, %s2041_s19   ;;  %s1385_s18 = sphi %s1462_s18, %s2040_s18   ;;  %s1381_s17 = sphi %s1460_s17, %s2039_s17  }
   0x3   : > { %s261_s22 = ssub.s32 %s1389_s19, %s1475_s21  ;;  %s264_s23 = sadd.s32 1, %s1385_s18 }
   0x4   : > { %p262_p0 = scmp.eq.s32.totalorder %s261_s22, 0  ;;  %p274_p1 = scmp.ne.s32.totalorder %s1385_s18, %s1381_s17 }
   0x5   : > { %p275_p2 = scmp.eq.s32.totalorder %s1473_s20, 1  ;;  %p1288_p3 = scmp.ge.s32.totalorder %s1389_s19, 1 }
   0x6   : > { %s1483_s24 = scalar_select %p262_p0, %s1385_s18, %s264_s23  }
   0x7   : > { %p1485_p4 = por %p275_p2, %p274_p1  ;;  %p338_p5 = scmp.lt.s32.totalorder %s1389_s19, 3 }
   0x9   : > { %p339_p6 = pnand %p1288_p3, %p338_p5 }
   0xa   : > { %s1290_s26 = sshll.u32 (!%p339_p6), %s1473_s20, 1  ;;  %s1391_s12 = smov (!%p339_p6), 112  }
   0xb   : > { %342 = sbr.rel (%p339_p6) target bundleno = 965 (0x3c5), region = 64  ;;  %p378_p7 = scmp.lt.s32.totalorder (!%p339_p6), %s1290_s26, 3 }
   0xc   : > { %s2032_s13 = smov (!%p339_p6), 111   ;;  %s1393_s14 = smov (!%p339_p6), 113  }
   0xd   : > { %s1394_s15 = smov (!%p339_p6), 127   ;;  %s1395_s16 = smov (!%p339_p6), 1  }
   0xe   : > { %s1396_s19 = smov (!%p339_p6), 15   ;;  %s2034_s22 = smov (!%p339_p6), 16  }
   0xf   : > { %s1398_s23 = smov (!%p339_p6), 17   ;;  %s374_s29 = sand.u32 (!%p339_p6), 1, %s1381_s17  }
  0x10   : > { %s2043_s26 = smov (!%p378_p7, %s1290_s26), 3  ;;  %vm398_vm0 = vcmask 1043456   ;;  %v405_v8 = vlaneseq  ;;  %v1298_v12 = vld [vmem:[%s2020_s0 + $0x10] ss:$8 sm:$0x3]  ;;  %v611_v40 = vld [vmem:[%s2023_s3] sm:$0xff] }
  0x11   : > { %s1291_s27 = sshll.u32 %s2043_s26, 2  ;;  %v1297_v14 = vld [vmem:[%s2020_s0 + $0x7] ss:$8 sm:$0x3]  ;;  %v540_v15 = vperm.slane %v1298_v12, 0  ;;  %v541_v16 = vperm.slane %v1298_v12, 1 }
  0x12   : > { %s381_s30 = scalar_lea.vmem %s2021_s1, %s1291_s27  ;;  %v1521_v11 = vand.u32 127, %v405_v8  ;;  %v1296_v17 = vld [vmem:[%s2020_s0 + $0x6] ss:$8 sm:$0x3]  ;;  %v522_v18 = vperm.slane %v1297_v14, 0  ;;  %v523_v19 = vperm.slane %v1297_v14, 1 }
  0x13   : > { %v384_v0 = vld [vmem:[%s381_s30] sm:$0xff]  ;;  %v504_v26 = vperm.slane %v1296_v17, 0  ;;  %v505_v27 = vperm.slane %v1296_v17, 1  ;;  %v1399_v42 = vmov 0   ;;  %vm567_vm9 = vcmask 588800   ;;  %s1289_s30 = sshll.u32 %s374_s29, 6 }
  0x14   : > { %386 = vst [vmem:[#allocation1] ss:$2 sm:$0xff] %v384_v0  ;;  %vm516_vm1 = vcmp.lt.s32.totalorder %v1521_v11, 112  ;;  %vm534_vm2 = vcmp.lt.s32.totalorder %v1521_v11, 111  ;;  %vm498_vm3 = vcmp.lt.s32.totalorder %v1521_v11, 113  ;;  %vm480_vm4 = vcmp.lt.s32.totalorder %v1521_v11, 127  ;;  %1364 = vset.pattern.permute.xlu1 %v1399_v42  ;;  %1365 = vset.pattern.permute.xlu2 %v1399_v42 }
  0x15   : > { %v1295_v32 = vld [vmem:[%s2020_s0 + $0x5] ss:$8 sm:$0x3]  ;;  %v1294_v49 = vld [vmem:[%s2020_s0 + $0x3] ss:$8 sm:$0x3]  ;;  %1366 = vset.pattern.permute.xlu0 %v1399_v42 }
  0x16   : > { %v486_v38 = vperm.slane %v1295_v32, 0  ;;  %v487_v39 = vperm.slane %v1295_v32, 1  ;;  %v619_v41 = vld [vmem:[%s2024_s4] sm:$0xff]  ;;  %vm460_vm5 = vcmp.lt.s32.totalorder %v1521_v11, 1  ;;  %v466_v51 = vperm.slane %v1294_v49, 0  ;;  %s2037_s17 = smov 111  }
  0x17   : > { %v1293_v50 = vld [vmem:[%s2020_s0 + $0x2] ss:$8 sm:$0x3]  ;;  %v467_v52 = vperm.slane %v1294_v49, 1  ;;  %vm442_vm6 = vcmp.lt.s32.totalorder %v1521_v11, 15  ;;  %vm424_vm7 = vcmp.lt.s32.totalorder %v1521_v11, 16 }
  0x18   : > { %v448_v53 = vperm.slane %v1293_v50, 0  ;;  %v449_v54 = vperm.slane %v1293_v50, 1  ;;  %vm407_vm8 = vcmp.lt.s32.totalorder %v1521_v11, 17  ;;  %vm799_vm10 = vcmask 130048  }
  0x19   : > { %vm1089_vm11 = vcmask 719872  }
  0x1b   : > { %v1493_v1 = vld.sshfl [vmem:[#allocation1] sm:$0xff pattern:$0x75316420]  ;;  %v1495_v2 = vld.sshfl [vmem:[#allocation1 + $0x8] sm:$0xff pattern:$0x75316420] }
  0x1c   : > { %393 = vst [vmem:[#allocation1] ss:$2 sm:$0xff] %v384_v0 }
  0x23   : > { %v1497_v3 = vld.sshfl [vmem:[#allocation1] sm:$0xff pattern:$0x75316420]  ;;  %v1504_v5 = vld.sshfl [vmem:[#allocation1 + $0x8] sm:$0xff pattern:$0x75316420] }
  0x24   : > { %v399_v4 = vsel %vm398_vm0, %v1497_v3, 0.0  ;;  %v400_v6 = vsel %vm398_vm0, %v1504_v5, 0.0 }
  0x25   : > { %512 = vrot.lane.b32.xlu1 %v399_v4, %s1391_s12  ;;  %530 = vrot.lane.b32.xlu0 %v399_v4, %s2032_s13 }
  0x26   : > { %494 = vrot.lane.b32.xlu2 %v399_v4, %s1393_s14 }
  0x2d   : > { %514 = vrot.lane.b32.xlu1 %v400_v6, %s1391_s12  ;;  %532 = vrot.lane.b32.xlu0 %v400_v6, %s2032_s13  ;;  %s1649_s13 = scalar_lea.vmem [#allocation3], %s1289_s30  ;;  %s1324_s30 = sshll.u32 (%p1485_p4), %s1473_s20, 4 }
  0x2e   : > { %496 = vrot.lane.b32.xlu2 %v400_v6, %s1393_s14  ;;  %391 = vst [vmem:[%s1649_s13 + $0x30] sm:$0xf] %v1493_v1  ;;  %v891_v1 = vld [vmem:[%s2027_s7] sm:$0xff] }
  0x2f   : > { %392 = vst [vmem:[%s1649_s13 + $0x38] sm:$0xf] %v1495_v2  ;;  %v883_v2 = vld [vmem:[%s2026_s6] sm:$0xff] }
  0x35   : > { %478 = vrot.lane.b32.xlu1 %v400_v6, %s1394_s15  ;;  %476 = vrot.lane.b32.xlu0 %v399_v4, %s1394_s15 }
  0x36   : > { %456 = vrot.lane.b32.xlu2 %v399_v4, %s1395_s16 }
  0x3d   : > { %438 = vrot.lane.b32.xlu1 %v399_v4, %s1396_s19  ;;  %458 = vrot.lane.b32.xlu0 %v400_v6, %s1395_s16 }
  0x3e   : > { %440 = vrot.lane.b32.xlu2 %v400_v6, %s1396_s19 }
  0x45   : > { %422 = vrot.lane.b32.xlu1 %v400_v6, %s2034_s22  ;;  %420 = vrot.lane.b32.xlu0 %v399_v4, %s2034_s22 }
  0x46   : > { %401 = vrot.lane.b32.xlu2 %v399_v4, %s1398_s23 }
  0x4d   : > { %403 = vrot.lane.b32.xlu0 %v400_v6, %s1398_s23  ;;  %614 = vperm.xlu1 %1364, %v611_v40   ;;  %v1292_v6 = vld [vmem:[%s2020_s0 + $0x1] ss:$8 sm:$0x3] }
  0x4e   : > { %622 = vperm.xlu2 %1365, %v619_v41   ;;  %v431_v8 = vperm.slane %v1292_v6, 1 }
  0x80   : > { %v495_v7 = vpop.permute.xlu2 %494 }
  0x88   : > { %v497_v13 = vpop.permute.xlu2 %496 }
  0x89   : > { %v499_v30 = vsel %vm498_vm3, %v495_v7, %v497_v13  ;;  %v500_v31 = vsel %vm498_vm3, %v497_v13, %v495_v7  ;;  %v430_v7 = vperm.slane %v1292_v6, 0 }
  0x8a   : > { %v1561_v36 = vmul.f32 %v504_v26, %v499_v30  ;;  %v1563_v37 = vmul.f32 %v505_v27, %v500_v31 }
  0x90   : > { %v457_v35 = vpop.permute.xlu2 %456 }
  0x97   : > { %v513_v9 = vpop.permute.xlu1 %512  ;;  %v531_v10 = vpop.permute.xlu0 %530 }
  0x98   : > { %v441_v55 = vpop.permute.xlu2 %440 }
  0x9f   : > { %v515_v20 = vpop.permute.xlu1 %514  ;;  %v533_v21 = vpop.permute.xlu0 %532 }
  0xa0   : > { %v517_v22 = vsel %vm516_vm1, %v513_v9, %v515_v20  ;;  %v518_v23 = vsel %vm516_vm1, %v515_v20, %v513_v9  ;;  %v535_v24 = vsel %vm534_vm2, %v531_v10, %v533_v21  ;;  %v536_v25 = vsel %vm534_vm2, %v533_v21, %v531_v10  ;;  %v402_v17 = vpop.permute.xlu2 %401 }
  0xa1   : > { %v1543_v28 = vmul.f32 %v540_v15, %v535_v24  ;;  %v1545_v29 = vmul.f32 %v541_v16, %v536_v25  ;;  %v1554_v33 = vmul.f32 %v522_v18, %v517_v22  ;;  %v1556_v34 = vmul.f32 %v523_v19, %v518_v23  ;;  %v410_v16 = vld [vmem:[%s2020_s0] ss:$8 sm:$0x3] }
  0xa2   : > { %v412_v18 = vperm.slane %v410_v16, 0  ;;  %v413_v19 = vperm.slane %v410_v16, 1  ;;  %v548_v25 = vld [vmem:[%s2022_s2] sm:$0xff] }
  0xa3   : > { %578 = vmatpush.msra.mxu0 %v1543_v28  ;;  %598 = vmatpush.msra.mxu1 %v1545_v29  ;;  %v1751_v16 = vld [vmem:[%s2020_s0 + $0x1] ss:$8 sm:$0x3] }
  0xa5   : > { %579 = vmatpush.msra.mxu0 %v1554_v33  ;;  %599 = vmatpush.msra.mxu1 %v1556_v34 }
  0xa7   : > { %v479_v43 = vpop.permute.xlu1 %478  ;;  %580 = vmatpush.msra.mxu0 %v1561_v36  ;;  %600 = vmatpush.msra.mxu1 %v1563_v37  ;;  %v477_v44 = vpop.permute.xlu0 %476 }
  0xa8   : > { %v481_v45 = vsel %vm480_vm4, %v477_v44, %v479_v43  ;;  %v482_v46 = vsel %vm480_vm4, %v479_v43, %v477_v44  ;;  %v623_v27 = vpop.permute.xlu2 %622  ;;  %v1695_v43 = vld [vmem:[%s2020_s0 + $0x6] ss:$8 sm:$0x3] }
  0xa9   : > { %v1579_v47 = vmul.f32 %v486_v38, %v481_v45  ;;  %v1581_v48 = vmul.f32 %v487_v39, %v482_v46  ;;  %v721_v44 = vperm.slane %v1695_v43, 0 }
  0xab   : > { %581 = vmatpush.msra.mxu0 %v1579_v47  ;;  %601 = vmatpush.msra.mxu1 %v1581_v48 }
  0xad   : > { %1325 = vmatpush.msk.msra.mxu0 %vm398_vm0, %v1497_v3  ;;  %1326 = vmatpush.msk.msra.mxu1 %vm398_vm0, %v1504_v5 }
  0xaf   : > { %v439_v56 = vpop.permute.xlu1 %438  ;;  %v459_v57 = vpop.permute.xlu0 %458 }
  0xb0   : > { %v461_v58 = vsel %vm460_vm5, %v457_v35, %v459_v57  ;;  %v462_v59 = vsel %vm460_vm5, %v459_v57, %v457_v35  ;;  %v443_v60 = vsel %vm442_vm6, %v439_v56, %v441_v55  ;;  %v444_v61 = vsel %vm442_vm6, %v441_v55, %v439_v56 }
  0xb1   : > { %v1605_v62 = vmul.f32 %v466_v51, %v462_v59  ;;  %v1607_v63 = vmul.f32 %v467_v52, %v461_v58  ;;  %v1609_v0 = vmul.f32 %v448_v53, %v444_v61  ;;  %v1611_v4 = vmul.f32 %v449_v54, %v443_v60  ;;  %v1709_v51 = vld [vmem:[%s2020_s0 + $0x5] ss:$8 sm:$0x3]  ;;  %v1717_v54 = vld [vmem:[%s2020_s0 + $0x3] ss:$8 sm:$0x3] }
  0xb2   : > { %v705_v53 = vperm.slane %v1709_v51, 0  ;;  %v687_v59 = vperm.slane %v1717_v54, 0  ;;  %v1735_v61 = vld [vmem:[%s2020_s0 + $0x2] ss:$8 sm:$0x3] }
  0xb3   : > { %583 = vmatpush.msra.mxu0 %v1605_v62  ;;  %603 = vmatpush.msra.mxu1 %v1607_v63 }
  0xb5   : > { %584 = vmatpush.msra.mxu0 %v1609_v0  ;;  %604 = vmatpush.msra.mxu1 %v1611_v4 }
  0xb7   : > { %v423_v9 = vpop.permute.xlu1 %422  ;;  %v421_v10 = vpop.permute.xlu0 %420 }
  0xb8   : > { %v425_v12 = vsel %vm424_vm7, %v421_v10, %v423_v9  ;;  %v426_v13 = vsel %vm424_vm7, %v423_v9, %v421_v10 }
  0xb9   : > { %v1625_v14 = vmul.f32 %v430_v7, %v426_v13  ;;  %v1627_v15 = vmul.f32 %v431_v8, %v425_v12  ;;  %v671_v8 = vperm.slane %v1735_v61, 0 }
  0xbb   : > { %585 = vmatpush.msra.mxu0 %v1625_v14  ;;  %605 = vmatpush.msra.mxu1 %v1627_v15 }
  0xbf   : > { %v404_v20 = vpop.permute.xlu0 %403  ;;  %v615_v26 = vpop.permute.xlu1 %614 }
  0xc0   : > { %v408_v21 = vsel %vm407_vm8, %v402_v17, %v404_v20  ;;  %v409_v22 = vsel %vm407_vm8, %v404_v20, %v402_v17  ;;  %v1756_v17 = vld [vmem:[%s2020_s0] ss:$8 sm:$0x3] }
  0xc1   : > { %v1639_v23 = vmul.f32 %v412_v18, %v409_v22  ;;  %v1641_v24 = vmul.f32 %v413_v19, %v408_v21  ;;  %v655_v18 = vperm.slane %v1751_v16, 0  ;;  %v639_v20 = vperm.slane %v1756_v17, 0 }
  0xc3   : > { %586 = vmatpush.msra.mxu0 %v1639_v23  ;;  %606 = vmatpush.msra.mxu1 %v1641_v24 }
  0xc4   : > { %1299 = vmatmul.msk.f32.vlgmr.msra.gmra.mxu0 %vm567_vm9, %v548_v25  ;;  %1300 = vmatmul.msk.f32.vlgmr.msra.gmra.mxu1 %vm567_vm9, %v548_v25 }
 0x141   : > { %v588_v30 = vpop.f32.mrf.mxu0  ;;  %v608_v31 = vpop.f32.mrf.mxu1 }
 0x142   : > { %v617_v32 = vmul.f32 %v615_v26, %v588_v30  ;;  %v618_v35 = vmul.f32 %v615_v26, %v608_v31  ;;  %v1307_v31 = vld [vmem:[%s2020_s0 + $0x10] ss:$8 sm:$0x3] }
 0x144   : > { %v625_v38 = vadd.f32 %v623_v27, %v617_v32  ;;  %v626_v39 = vadd.f32 %v623_v27, %v618_v35  ;;  %v753_v32 = vperm.slane %v1307_v31, 0  ;;  %v754_v35 = vperm.slane %v1307_v31, 1 }
 0x146   : > { %v627_v40 = vmax.f32 %v625_v38, 0.0  ;;  %v1655_v41 = vmax.f32 %v626_v39, 0.0 }
 0x148   : > { %697 = vrot.lane.b32.xlu2 %v627_v40, %s1394_s15  ;;  %713 = vrot.lane.b32.xlu0 %v627_v40, %s1393_s14  ;;  %629 = vst [vmem:[%s1649_s13 + $0x20] sm:$0xff] %v627_v40 }
 0x149   : > { %715 = vrot.lane.b32.xlu1 %v1655_v41, %s1393_s14  ;;  %630 = vst [vmem:[%s1649_s13 + $0x28] sm:$0xff] %v1655_v41 }
 0x150   : > { %681 = vrot.lane.b32.xlu2 %v1655_v41, %s1395_s16  ;;  %699 = vrot.lane.b32.xlu0 %v1655_v41, %s1394_s15 }
 0x151   : > { %679 = vrot.lane.b32.xlu1 %v627_v40, %s1395_s16 }
 0x158   : > { %647 = vrot.lane.b32.xlu2 %v627_v40, %s2034_s22  ;;  %663 = vrot.lane.b32.xlu0 %v627_v40, %s1396_s19 }
 0x159   : > { %665 = vrot.lane.b32.xlu1 %v1655_v41, %s1396_s19 }
 0x160   : > { %633 = vrot.lane.b32.xlu2 %v1655_v41, %s1398_s23  ;;  %649 = vrot.lane.b32.xlu0 %v1655_v41, %s2034_s22 }
 0x161   : > { %631 = vrot.lane.b32.xlu1 %v627_v40, %s1398_s23 }
 0x168   : > { %729 = vrot.lane.b32.xlu2 %v627_v40, %s1391_s12  ;;  %745 = vrot.lane.b32.xlu0 %v627_v40, %s2037_s17 }
 0x169   : > { %747 = vrot.lane.b32.xlu1 %v1655_v41, %s2037_s17 }
 0x170   : > { %894 = vperm.xlu2 %1365, %v891_v1   ;;  %731 = vrot.lane.b32.xlu0 %v1655_v41, %s1391_s12 }
 0x171   : > { %886 = vperm.xlu1 %1364, %v883_v2  }
 0x1a2   : > { %v1690_v42 = vpop.permute.xlu2 %697 }
 0x1aa   : > { %v1711_v52 = vpop.permute.xlu2 %681 }
 0x1b2   : > { %v1737_v7 = vpop.permute.xlu2 %647 }
 0x1ba   : > { %v1698_v45 = vpop.permute.xlu0 %713  ;;  %v1762_v21 = vpop.permute.xlu2 %633 }
 0x1bb   : > { %v1700_v46 = vpop.permute.xlu1 %715 }
 0x1bc   : > { %v717_v49 = vsel %vm498_vm3, %v1698_v45, %v1700_v46 }
 0x1bd   : > { %v725_v50 = vmul.f32 %v721_v44, %v717_v49  ;;  %v1306_v49 = vld [vmem:[%s2020_s0 + $0x7] ss:$8 sm:$0x3] }
 0x1bf   : > { %803 = vmatpush.msra.mxu2 %v725_v50  ;;  %1093 = vmatpush.msrb.mxu1 %v725_v50 }
 0x1c2   : > { %v1719_v55 = vpop.permute.xlu0 %699  ;;  %v730_v50 = vpop.permute.xlu2 %729 }
 0x1c3   : > { %v701_v56 = vsel %vm480_vm4, %v1690_v42, %v1719_v55  ;;  %v1725_v57 = vpop.permute.xlu1 %679 }
 0x1c4   : > { %v709_v58 = vmul.f32 %v705_v53, %v701_v56  ;;  %v684_v60 = vsel %vm460_vm5, %v1711_v52, %v1725_v57  ;;  %v718_v56 = vsel %vm498_vm3, %v1700_v46, %v1698_v45  ;;  %v702_v45 = vsel %vm480_vm4, %v1719_v55, %v1690_v42  ;;  %v761_v42 = vld [vmem:[%s2025_s5] sm:$0xff] }
 0x1c5   : > { %v691_v6 = vmul.f32 %v687_v59, %v684_v60  ;;  %v688_v55 = vperm.slane %v1717_v54, 1  ;;  %v683_v60 = vsel %vm460_vm5, %v1725_v57, %v1711_v52 }
 0x1c6   : > { %804 = vmatpush.msra.mxu2 %v709_v58  ;;  %1094 = vmatpush.msrb.mxu1 %v709_v58 }
 0x1c7   : > { %v692_v52 = vmul.f32 %v688_v55, %v683_v60 }
 0x1c8   : > { %805 = vmatpush.msra.mxu2 %v627_v40  ;;  %1095 = vmatpush.msrb.mxu1 %v627_v40 }
 0x1ca   : > { %v1740_v9 = vpop.permute.xlu0 %663  ;;  %806 = vmatpush.msra.mxu2 %v691_v6  ;;  %1096 = vmatpush.msrb.mxu1 %v691_v6 }
 0x1cb   : > { %v1742_v10 = vpop.permute.xlu1 %665 }
 0x1cc   : > { %v668_v12 = vsel %vm442_vm6, %v1742_v10, %v1740_v9  ;;  %v667_v6 = vsel %vm442_vm6, %v1740_v9, %v1742_v10 }
 0x1cd   : > { %v675_v13 = vmul.f32 %v671_v8, %v668_v12 }
 0x1cf   : > { %807 = vmatpush.msra.mxu2 %v675_v13  ;;  %1097 = vmatpush.msrb.mxu1 %v675_v13 }
 0x1d2   : > { %v1759_v19 = vpop.permute.xlu0 %649 }
 0x1d3   : > { %v652_v22 = vsel %vm424_vm7, %v1759_v19, %v1737_v7  ;;  %v1768_v25 = vpop.permute.xlu1 %631  ;;  %v651_v54 = vsel %vm424_vm7, %v1737_v7, %v1759_v19 }
 0x1d4   : > { %v636_v26 = vsel %vm407_vm8, %v1762_v21, %v1768_v25  ;;  %v659_v27 = vmul.f32 %v655_v18, %v652_v22 }
 0x1d5   : > { %v643_v30 = vmul.f32 %v639_v20, %v636_v26  ;;  %v1316_v20 = vld [vmem:[%s2020_s0 + $0x10] ss:$8 sm:$0x3] }
 0x1d6   : > { %808 = vmatpush.msra.mxu2 %v659_v27  ;;  %1098 = vmatpush.msrb.mxu1 %v659_v27  ;;  %v1025_v22 = vperm.slane %v1316_v20, 0 }
 0x1d8   : > { %809 = vmatpush.msra.mxu2 %v643_v30  ;;  %1099 = vmatpush.msrb.mxu1 %v643_v30 }
 0x1da   : > { %v746_v38 = vpop.permute.xlu0 %745  ;;  %810 = vmatpush.msra.mxu2 %v1543_v28  ;;  %1100 = vmatpush.msrb.mxu1 %v1543_v28  ;;  %v737_v28 = vperm.slane %v1306_v49, 0 }
 0x1db   : > { %v748_v39 = vpop.permute.xlu1 %747 }
 0x1dc   : > { %v749_v40 = vsel %vm534_vm2, %v746_v38, %v748_v39  ;;  %v750_v1 = vsel %vm534_vm2, %v748_v39, %v746_v38  ;;  %811 = vmatpush.msra.mxu2 %v1554_v33  ;;  %1101 = vmatpush.msrb.mxu1 %v1554_v33  ;;  %v738_v33 = vperm.slane %v1306_v49, 1 }
 0x1dd   : > { %v1785_v2 = vmul.f32 %v753_v32, %v749_v40  ;;  %v1787_v44 = vmul.f32 %v754_v35, %v750_v1 }
 0x1de   : > { %812 = vmatpush.msra.mxu2 %v1561_v36  ;;  %1102 = vmatpush.msrb.mxu1 %v1561_v36  ;;  %v722_v36 = vperm.slane %v1695_v43, 1  ;;  %v706_v43 = vperm.slane %v1709_v51, 1 }
 0x1df   : > { %837 = vmatpush.msra.mxu3 %v1785_v2  ;;  %877 = vmatpush.msrb.mxu0 %v1787_v44 }
 0x1e0   : > { %813 = vmatpush.msra.mxu2 %v1579_v47  ;;  %1103 = vmatpush.msrb.mxu1 %v1579_v47  ;;  %v726_v46 = vmul.f32 %v722_v36, %v718_v56  ;;  %v710_v51 = vmul.f32 %v706_v43, %v702_v45 }
 0x1e2   : > { %v732_v53 = vpop.permute.xlu0 %731  ;;  %1327 = vmatpush.msk.msra.mxu2 %vm398_vm0, %v1497_v3  ;;  %1329 = vmatpush.msk.msrb.mxu1 %vm398_vm0, %v1497_v3 }
 0x1e3   : > { %v733_v47 = vsel %vm516_vm1, %v730_v50, %v732_v53  ;;  %v734_v58 = vsel %vm516_vm1, %v732_v53, %v730_v50 }
 0x1e4   : > { %815 = vmatpush.msra.mxu2 %v1605_v62  ;;  %1105 = vmatpush.msrb.mxu1 %v1605_v62  ;;  %v1813_v59 = vmul.f32 %v737_v28, %v733_v47  ;;  %v1815_v3 = vmul.f32 %v738_v33, %v734_v58  ;;  %v762_v62 = vld [vmem:[%s2025_s5 + $0x8] sm:$0xff] }
 0x1e5   : > { %v1314_v28 = vld [vmem:[%s2020_s0 + $0x6] ss:$8 sm:$0x3] }
 0x1e6   : > { %816 = vmatpush.msra.mxu2 %v1609_v0  ;;  %838 = vmatpush.msra.mxu3 %v1813_v59  ;;  %v993_v53 = vperm.slane %v1314_v28, 0  ;;  %v994_v36 = vperm.slane %v1314_v28, 1 }
 0x1e7   : > { %878 = vmatpush.msrb.mxu0 %v1815_v3  ;;  %1106 = vmatpush.msrb.mxu1 %v1609_v0  ;;  %v672_v0 = vperm.slane %v1735_v61, 1  ;;  %v640_v61 = vperm.slane %v1756_v17, 1  ;;  %v1173_v17 = vld [vmem:[%s2029_s9] sm:$0xff] }
 0x1e8   : > { %843 = vmatpush.msrb.mxu3 %v726_v46  ;;  %817 = vmatpush.msra.mxu2 %v1625_v14 }
 0x1e9   : > { %1107 = vmatpush.msrb.mxu1 %v1625_v14  ;;  %1308 = vmatmul.msk.f32.vlgmr.msra.gmra.mxu3 %vm799_vm10, %v762_v62  ;;  %v656_v14 = vperm.slane %v1751_v16, 1  ;;  %v676_v57 = vmul.f32 %v672_v0, %v667_v6  ;;  %v1181_v16 = vld [vmem:[%s2030_s10] sm:$0xff] }
 0x1ea   : > { %844 = vmatpush.msrb.mxu3 %v710_v51  ;;  %818 = vmatpush.msra.mxu2 %v1639_v23  ;;  %v1312_v0 = vld [vmem:[%s2020_s0 + $0x3] ss:$8 sm:$0x3] }
 0x1eb   : > { %1108 = vmatpush.msrb.mxu1 %v1639_v23  ;;  %819 = vmatmul.f32.vlgmr.msra.gmra.mxu2 %v761_v42  ;;  %v635_v23 = vsel %vm407_vm8, %v1768_v25, %v1762_v21  ;;  %v660_v8 = vmul.f32 %v656_v14, %v651_v54  ;;  %v1315_v21 = vld [vmem:[%s2020_s0 + $0x7] ss:$8 sm:$0x3]  ;;  %v1026_v25 = vperm.slane %v1316_v20, 1 }
 0x1ec   : > { %845 = vmatpush.msrb.mxu3 %v1655_v41  ;;  %1133 = vmatpush.msrb.mxu2 %v726_v46  ;;  %v644_v9 = vmul.f32 %v640_v61, %v635_v23  ;;  %v1009_v27 = vperm.slane %v1315_v21, 0  ;;  %v1010_v30 = vperm.slane %v1315_v21, 1  ;;  %v959_v23 = vperm.slane %v1312_v0, 0 }
 0x1ed   : > { %1309 = vmatmul.msk.f32.vlgmr.msrb.gmra.mxu0 %vm799_vm10, %v762_v62  ;;  %v1033_v62 = vld [vmem:[%s2028_s8] sm:$0xff] }
 0x1ee   : > { %846 = vmatpush.msrb.mxu3 %v692_v52  ;;  %1134 = vmatpush.msrb.mxu2 %v710_v51  ;;  %v1313_v51 = vld [vmem:[%s2020_s0 + $0x5] ss:$8 sm:$0x3] }
 0x1ef   : > { %1109 = vmatmul.f32.vlgmr.msrb.gmra.mxu1 %v1033_v62  ;;  %v977_v55 = vperm.slane %v1313_v51, 0  ;;  %v978_v60 = vperm.slane %v1313_v51, 1  ;;  %v1225_v51 = vld [vmem:[%s1649_s13 + $0x28] sm:$0xff] (%p1485_p4) }
 0x1f0   : > { %847 = vmatpush.msrb.mxu3 %v676_v57  ;;  %1135 = vmatpush.msrb.mxu2 %v1655_v41  ;;  %v895_v41 = vpop.permute.xlu2 %894 }
 0x1f2   : > { %848 = vmatpush.msrb.mxu3 %v660_v8  ;;  %1136 = vmatpush.msrb.mxu2 %v692_v52 }
 0x1f4   : > { %849 = vmatpush.msrb.mxu3 %v644_v9  ;;  %1137 = vmatpush.msrb.mxu2 %v676_v57 }
 0x1f6   : > { %850 = vmatpush.msrb.mxu3 %v1545_v29  ;;  %1138 = vmatpush.msrb.mxu2 %v660_v8  ;;  %v960_v8 = vperm.slane %v1312_v0, 1 }
 0x1f8   : > { %851 = vmatpush.msrb.mxu3 %v1556_v34  ;;  %1139 = vmatpush.msrb.mxu2 %v644_v9 }
 0x1fa   : > { %852 = vmatpush.msrb.mxu3 %v1563_v37  ;;  %1140 = vmatpush.msrb.mxu2 %v1545_v29 }
 0x1fc   : > { %853 = vmatpush.msrb.mxu3 %v1581_v48  ;;  %1141 = vmatpush.msrb.mxu2 %v1556_v34 }
 0x1fe   : > { %1328 = vmatpush.msk.msrb.mxu3 %vm398_vm0, %v1504_v5  ;;  %1142 = vmatpush.msrb.mxu2 %v1563_v37 }
 0x200   : > { %855 = vmatpush.msrb.mxu3 %v1607_v63  ;;  %1143 = vmatpush.msrb.mxu2 %v1581_v48  ;;  %v887_v48 = vpop.permute.xlu1 %886 }
 0x202   : > { %856 = vmatpush.msrb.mxu3 %v1611_v4  ;;  %1330 = vmatpush.msk.msrb.mxu2 %vm398_vm0, %v1504_v5 }
 0x204   : > { %857 = vmatpush.msrb.mxu3 %v1627_v15  ;;  %1145 = vmatpush.msrb.mxu2 %v1607_v63 }
 0x206   : > { %858 = vmatpush.msrb.mxu3 %v1641_v24  ;;  %1146 = vmatpush.msrb.mxu2 %v1611_v4 }
 0x207   : > { %859 = vmatmul.f32.vlgmr.msrb.gmra.mxu3 %v761_v42 }
 0x208   : > { %1147 = vmatpush.msrb.mxu2 %v1627_v15 }
 0x20a   : > { %1148 = vmatpush.msrb.mxu2 %v1641_v24 }
 0x20b   : > { %1149 = vmatmul.f32.vlgmr.msrb.gmra.mxu2 %v1033_v62  ;;  %v1223_v62 = vld [vmem:[%s1649_s13 + $0x20] sm:$0xff] (%p1485_p4) }
 0x26a   : > { %v880_v63 = vpop.f32.mrf.mxu0 }
 0x26c   : > { %v840_v29 = vpop.f32.mrf.mxu3  ;;  %v1110_v11 = vpop.f32.mrf.mxu1 }
 0x26e   : > { %v820_v34 = vpop.f32.mrf.mxu2 }
 0x26f   : > { %v841_v37 = vadd.f32 %v840_v29, %v820_v34  ;;  %v1311_v34 = vld [vmem:[%s2020_s0 + $0x2] ss:$8 sm:$0x3] }
 0x271   : > { %v889_v5 = vmul.f32 %v887_v48, %v841_v37 }
 0x273   : > { %v897_v7 = vadd.f32 %v895_v41, %v889_v5  ;;  %v943_v5 = vperm.slane %v1311_v34, 0 }
 0x275   : > { %v1880_v10 = vmax.f32 %v897_v7, 0.0 }
 0x277   : > { %1001 = vrot.lane.b32.xlu2 %v1880_v10, %s1391_s12  ;;  %1017 = vrot.lane.b32.xlu0 %v1880_v10, %s2037_s17  ;;  %901 = vst [vmem:[%s1649_s13 + $0x10] sm:$0xff] %v1880_v10 }
 0x28a   : > { %v860_v4 = vpop.f32.mrf.mxu3 }
 0x28b   : > { %v881_v15 = vadd.f32 %v880_v63, %v860_v4 }
 0x28d   : > { %v890_v24 = vmul.f32 %v887_v48, %v881_v15 }
 0x28f   : > { %v898_v12 = vadd.f32 %v895_v41, %v890_v24  ;;  %v944_v41 = vperm.slane %v1311_v34, 1 }
 0x291   : > { %v1888_v13 = vmax.f32 %v898_v12, 0.0 }
 0x293   : > { %1019 = vrot.lane.b32.xlu1 %v1888_v13, %s2037_s17  ;;  %987 = vrot.lane.b32.xlu2 %v1888_v13, %s1393_s14  ;;  %902 = vst [vmem:[%s1649_s13 + $0x18] sm:$0xff] %v1888_v13  ;;  %s1202_s17 = scalar_lea.vmem (%p1485_p4), %s2031_s11, %s1324_s30 }
 0x294   : > { %1003 = vrot.lane.b32.xlu0 %v1888_v13, %s1391_s12  ;;  %s2038_s12 = smov 16   ;;  %1224 = vst [vmem:[%s1202_s17 + $0x40] sm:$0xff] (%p1485_p4), %v1223_v62 }
 0x295   : > { %1226 = vst [vmem:[%s1202_s17 + $0x48] sm:$0xff] (%p1485_p4), %v1225_v51 }
 0x29b   : > { %985 = vrot.lane.b32.xlu1 %v1880_v10, %s1393_s14  ;;  %951 = vrot.lane.b32.xlu2 %v1880_v10, %s1395_s16 }
 0x29c   : > { %969 = vrot.lane.b32.xlu0 %v1880_v10, %s1394_s15 }
 0x2a3   : > { %971 = vrot.lane.b32.xlu1 %v1888_v13, %s1394_s15  ;;  %937 = vrot.lane.b32.xlu2 %v1888_v13, %s1396_s19 }
 0x2a4   : > { %953 = vrot.lane.b32.xlu0 %v1888_v13, %s1395_s16 }
 0x2ab   : > { %935 = vrot.lane.b32.xlu1 %v1880_v10, %s1396_s19  ;;  %903 = vrot.lane.b32.xlu2 %v1880_v10, %s1398_s23 }
 0x2ac   : > { %919 = vrot.lane.b32.xlu0 %v1880_v10, %s2038_s12 }
 0x2b3   : > { %921 = vrot.lane.b32.xlu1 %v1888_v13, %s2038_s12  ;;  %1184 = vperm.xlu2 %1365, %v1181_v16  }
 0x2b4   : > { %905 = vrot.lane.b32.xlu0 %v1888_v13, %s1398_s23 }
 0x2bb   : > { %1176 = vperm.xlu1 %1364, %v1173_v17  }
 0x2d1   : > { %v1002_v19 = vpop.permute.xlu2 %1001 }
 0x2e9   : > { %v1018_v18 = vpop.permute.xlu0 %1017 }
 0x2ed   : > { %v988_v49 = vpop.permute.xlu2 %987 }
 0x2f5   : > { %v952_v42 = vpop.permute.xlu2 %951 }
 0x2fd   : > { %v938_v7 = vpop.permute.xlu2 %937 }
 0x305   : > { %v1020_v26 = vpop.permute.xlu1 %1019 }
 0x306   : > { %v1021_v31 = vsel %vm534_vm2, %v1018_v18, %v1020_v26  ;;  %v1022_v32 = vsel %vm534_vm2, %v1020_v26, %v1018_v18  ;;  %v1004_v35 = vpop.permute.xlu0 %1003 }
 0x307   : > { %v1029_v38 = vmul.f32 %v1025_v22, %v1021_v31  ;;  %v1030_v39 = vmul.f32 %v1026_v25, %v1022_v32  ;;  %v1005_v40 = vsel %vm516_vm1, %v1002_v19, %v1004_v35  ;;  %v1006_v1 = vsel %vm516_vm1, %v1004_v35, %v1002_v19  ;;  %v904_v22 = vpop.permute.xlu2 %903 }
 0x308   : > { %v1013_v33 = vmul.f32 %v1009_v27, %v1005_v40  ;;  %v1014_v50 = vmul.f32 %v1010_v30, %v1006_v1  ;;  %v1034_v40 = vld [vmem:[%s2028_s8 + $0x8] sm:$0xff] }
 0x309   : > { %1118 = vmatpush.msra.mxu0 %v1029_v38  ;;  %1158 = vmatpush.msra.mxu3 %v1030_v39 }
 0x30b   : > { %1119 = vmatpush.msra.mxu0 %v1013_v33  ;;  %1159 = vmatpush.msra.mxu3 %v1014_v50 }
 0x30d   : > { %v986_v56 = vpop.permute.xlu1 %985 }
 0x30e   : > { %v989_v47 = vsel %vm498_vm3, %v986_v56, %v988_v49  ;;  %v990_v58 = vsel %vm498_vm3, %v988_v49, %v986_v56  ;;  %v970_v43 = vpop.permute.xlu0 %969 }
 0x30f   : > { %v997_v45 = vmul.f32 %v993_v53, %v989_v47  ;;  %v998_v46 = vmul.f32 %v994_v36, %v990_v58  ;;  %v1185_v33 = vpop.permute.xlu2 %1184 }
 0x311   : > { %1120 = vmatpush.msra.mxu0 %v997_v45  ;;  %1160 = vmatpush.msra.mxu3 %v998_v46  ;;  %v1219_v45 = vld [vmem:[%s1649_s13 + $0x10] sm:$0xff] (%p1485_p4)  ;;  %v1221_v46 = vld [vmem:[%s1649_s13 + $0x18] sm:$0xff] (%p1485_p4) }
 0x312   : > { %1220 = vst [vmem:[%s1202_s17 + $0x20] sm:$0xff] (%p1485_p4), %v1219_v45 }
 0x313   : > { %1222 = vst [vmem:[%s1202_s17 + $0x28] sm:$0xff] (%p1485_p4), %v1221_v46 }
 0x315   : > { %v972_v6 = vpop.permute.xlu1 %971 }
 0x316   : > { %v973_v52 = vsel %vm480_vm4, %v970_v43, %v972_v6  ;;  %v974_v14 = vsel %vm480_vm4, %v972_v6, %v970_v43  ;;  %v954_v54 = vpop.permute.xlu0 %953 }
 0x317   : > { %v981_v57 = vmul.f32 %v977_v55, %v973_v52  ;;  %v982_v61 = vmul.f32 %v978_v60, %v974_v14  ;;  %v955_v9 = vsel %vm460_vm5, %v952_v42, %v954_v54  ;;  %v956_v29 = vsel %vm460_vm5, %v954_v54, %v952_v42  ;;  %v1227_v42 = vld [vmem:[%s1649_s13 + $0x30] sm:$0xff] (%p1485_p4)  ;;  %v1229_v55 = vld [vmem:[%s1649_s13 + $0x38] sm:$0xff] (%p1485_p4) }
 0x318   : > { %v963_v37 = vmul.f32 %v959_v23, %v956_v29  ;;  %v964_v48 = vmul.f32 %v960_v8, %v955_v9  ;;  %1228 = vst [vmem:[%s1202_s17 + $0x60] sm:$0xff] (%p1485_p4), %v1227_v42 }
 0x319   : > { %1121 = vmatpush.msra.mxu0 %v981_v57  ;;  %1161 = vmatpush.msra.mxu3 %v982_v61  ;;  %1230 = vst [vmem:[%s1202_s17 + $0x68] sm:$0xff] (%p1485_p4), %v1229_v55 }
 0x31b   : > { %1122 = vmatpush.msra.mxu0 %v1880_v10  ;;  %1162 = vmatpush.msra.mxu3 %v1888_v13  ;;  %v1310_v10 = vld [vmem:[%s2020_s0 + $0x1] ss:$8 sm:$0x3]  ;;  %v909_v13 = vld [vmem:[%s2020_s0] ss:$8 sm:$0x3] }
 0x31c   : > { %v927_v17 = vperm.slane %v1310_v10, 0  ;;  %v928_v18 = vperm.slane %v1310_v10, 1  ;;  %v911_v20 = vperm.slane %v909_v13, 0  ;;  %v912_v21 = vperm.slane %v909_v13, 1 }
 0x31d   : > { %v936_v63 = vpop.permute.xlu1 %935  ;;  %1123 = vmatpush.msra.mxu0 %v963_v37  ;;  %1163 = vmatpush.msra.mxu3 %v964_v48 }
 0x31e   : > { %v939_v4 = vsel %vm442_vm6, %v936_v63, %v938_v7  ;;  %v940_v15 = vsel %vm442_vm6, %v938_v7, %v936_v63  ;;  %v920_v24 = vpop.permute.xlu0 %919 }
 0x31f   : > { %v947_v12 = vmul.f32 %v943_v5, %v940_v15  ;;  %v948_v16 = vmul.f32 %v944_v41, %v939_v4 }
 0x321   : > { %1124 = vmatpush.msra.mxu0 %v947_v12  ;;  %1164 = vmatpush.msra.mxu3 %v948_v16 }
 0x325   : > { %v922_v19 = vpop.permute.xlu1 %921 }
 0x326   : > { %v923_v25 = vsel %vm424_vm7, %v920_v24, %v922_v19  ;;  %v924_v26 = vsel %vm424_vm7, %v922_v19, %v920_v24  ;;  %v906_v27 = vpop.permute.xlu0 %905 }
 0x327   : > { %v931_v30 = vmul.f32 %v927_v17, %v924_v26  ;;  %v932_v31 = vmul.f32 %v928_v18, %v923_v25  ;;  %v907_v32 = vsel %vm407_vm8, %v904_v22, %v906_v27  ;;  %v908_v35 = vsel %vm407_vm8, %v906_v27, %v904_v22 }
 0x328   : > { %v915_v38 = vmul.f32 %v911_v20, %v908_v35  ;;  %v916_v39 = vmul.f32 %v912_v21, %v907_v32 }
 0x329   : > { %1125 = vmatpush.msra.mxu0 %v931_v30  ;;  %1165 = vmatpush.msra.mxu3 %v932_v31 }
 0x32b   : > { %1126 = vmatpush.msra.mxu0 %v915_v38  ;;  %1166 = vmatpush.msra.mxu3 %v916_v39 }
 0x32d   : > { %1127 = vmatpush.msra.mxu0 %v1785_v2  ;;  %1167 = vmatpush.msra.mxu3 %v1787_v44  ;;  %v1177_v28 = vpop.permute.xlu1 %1176  ;;  %v1150_v44 = vpop.f32.mrf.mxu2 }
 0x32f   : > { %1128 = vmatpush.msra.mxu0 %v1813_v59  ;;  %1168 = vmatpush.msra.mxu3 %v1815_v3 }
 0x330   : > { %1317 = vmatmul.msk.f32.vlgmr.msra.gmra.mxu0 %vm1089_vm11, %v1034_v40  ;;  %1318 = vmatmul.msk.f32.vlgmr.msra.gmra.mxu3 %vm1089_vm11, %v1034_v40 }
 0x3ad   : > { %v1130_v1 = vpop.f32.mrf.mxu0 }
 0x3ae   : > { %v1131_v49 = vadd.f32 %v1130_v1, %v1110_v11 }
 0x3b0   : > { %v1179_v2 = vmul.f32 %v1177_v28, %v1131_v49 }
 0x3b2   : > { %v1187_v50 = vadd.f32 %v1185_v33, %v1179_v2 }
 0x3b3   : > { %v1170_v53 = vpop.f32.mrf.mxu3 }
 0x3b4   : > { %v1189_v36 = vmax.f32 %v1187_v50, 0.0  ;;  %v1171_v56 = vadd.f32 %v1170_v53, %v1150_v44 }
 0x3b6   : > { %1191 = vst [vmem:[%s1649_s13] sm:$0xff] %v1189_v36  ;;  %v1180_v47 = vmul.f32 %v1177_v28, %v1171_v56 }
 0x3b8   : > { %v1188_v58 = vadd.f32 %v1185_v33, %v1180_v47  ;;  %1199 = sbr.rel (!%p1485_p4) target bundleno = 965 (0x3c5), region = 68 }
 0x3ba   : > { %v1190_v59 = vmax.f32 %v1188_v58, 0.0 }
 0x3bc   : > { %1192 = vst [vmem:[%s1649_s13 + $0x8] sm:$0xff] %v1190_v59 }
 0x3bd   : > { %v1215_v3 = vld [vmem:[%s1649_s13] sm:$0xff] }
 0x3be   : > { %1216 = vst [vmem:[%s1202_s17] sm:$0xff] %v1215_v3 }
 0x3c3   : > { %v1217_v43 = vld [vmem:[%s1649_s13 + $0x8] sm:$0xff] }
 0x3c4   : > { %1218 = vst [vmem:[%s1202_s17 + $0x8] sm:$0xff] %v1217_v43 }
 0x3c5 PF: > { %p18_p8 = scmp.ge.s32.totalorder %s1475_s21, 4   ;;  %s2039_s17 = smov %s1385_s18 }
 0x3c6   : > { %s2040_s18 = smov %s1483_s24  ;;  %s2041_s19 = smov %s1475_s21 }
 0x3c7   :  { %20 = sbr.rel (!%p18_p8) target bundleno = 2 (0x2), region = 124 }

</bundles_post_ra>
